<compile_context>
chip_gen: v7x
topology: tpu7x:2x2x1
jax: 0.10.0
libtpu: 0.0.40
codegen_flags: <defaults>
</compile_context>

<pallas_src>
import functools

import jax
import jax.numpy as jnp
from jax.experimental import pallas as pl
from jax.experimental.pallas import tpu as pltpu

# args.F_dim, args.L_dim, args.N_dim, args.D_out_dim
F_DIM = 32
L_DIM = 32
N_DIM = 16
D_OUT = 32
IMG_C = 3
FUSE_DIM = F_DIM + L_DIM + N_DIM          # 80

MAX_TILE = 4096                           # max pixels (lanes) per grid step

# ---- bf16 MXU weight buffer: transposed weights (Cout, Cin) at lane 0 -------
_WG_R, _WD_R, _WO_R = 0, 32, 64
_WP_ROWS, _WP_COLS = 80, 128              # (16,128)-aligned for bf16

# ---- f32 small-parameter buffer: encoder weights + all biases ---------------
_ENC_F_R, _ENC_L_R, _BIAS_R = 0, 32, 64
_BP_ROWS, _BP_COLS = 96, 128


# --------------------------------- kernel ------------------------------------
def vae_forward_kernel(img_ref, lbl_ref, eps_ref, wp_ref, bp_ref, out_ref,
                       flz_ref):
    x_img = img_ref[0]                                # (3, TN) f32 lane-dense
    x_lbl = lbl_ref[0]                                # (3, TN) f32

    dot = functools.partial(jnp.dot, preferred_element_type=jnp.float32)

    # frame_transformation / label_transformation: K=3 per-pixel "1x1 convs"
    # done as VPU FMA chains (a K=3 MXU pass would be >97% padding).
    def encoder(row, cdim, x):
        w0 = bp_ref[row:row + cdim, 0:1]
        w1 = bp_ref[row:row + cdim, 1:2]
        w2 = bp_ref[row:row + cdim, 2:3]
        b = bp_ref[row:row + cdim, 3:4]
        y = w0 * x[0:1, :] + w1 * x[1:2, :] + w2 * x[2:3, :] + b
        return jnp.maximum(y, 0.0)                    # ReLU

    f = encoder(_ENC_F_R, F_DIM, x_img)               # (F_DIM, TN) f32
    l = encoder(_ENC_L_R, L_DIM, x_lbl)               # (L_DIM, TN) f32

    # Stage f / l into the contiguous bf16 fusion scratch (rows 0..63).
    flz_ref[0:F_DIM, :] = f.astype(jnp.bfloat16)
    flz_ref[F_DIM:F_DIM + L_DIM, :] = l.astype(jnp.bfloat16)

    # Gaussian_Predictor: concat(f, l) -> (mu, logvar) as ONE K=64 bf16 dot.
    wg = wp_ref[_WG_R:_WG_R + 2 * N_DIM, 0:F_DIM + L_DIM]      # (32, 64) bf16
    bg = bp_ref[_BIAS_R:_BIAS_R + 2 * N_DIM, 0:1]               # (32, 1) f32
    h = dot(wg, flz_ref[0:F_DIM + L_DIM, :]) + bg               # (32, TN) f32
    mu = h[:N_DIM, :]
    logvar = h[N_DIM:, :]

    # reparameterization trick: z = mu + exp(.5*logvar) * eps (eps streamed in)
    eps = eps_ref[0].astype(jnp.float32)                        # (N_DIM, TN)
    z = mu + jnp.exp(0.5 * logvar) * eps
    flz_ref[F_DIM + L_DIM:, :] = z.astype(jnp.bfloat16)

    # Decoder_Fusion: concat(f, l, z) -> D_OUT as ONE K=80 bf16 dot, ReLU.
    wd = wp_ref[_WD_R:_WD_R + D_OUT, 0:FUSE_DIM]                # (32, 80) bf16
    bd = bp_ref[_BIAS_R:_BIAS_R + D_OUT, 1:2]                   # (32, 1) f32
    d = jnp.maximum(dot(wd, flz_ref[...]) + bd, 0.0)            # (D_OUT, TN)

    # Generator: D_OUT -> 3, sigmoid output in [0, 1].
    wo = wp_ref[_WO_R:_WO_R + IMG_C, 0:D_OUT]                   # (3, 32) bf16
    bo = bp_ref[_BIAS_R:_BIAS_R + IMG_C, 2:3]                   # (3, 1) f32
    out_ref[0] = jax.nn.sigmoid(dot(wo, d.astype(jnp.bfloat16)) + bo)


# ------------------------------ params plumbing ------------------------------
def init_params(key):
    """Deterministic parameter init (shapes implied by the module __init__)."""
    ks = jax.random.split(key, 5)

    def dense(k, cin, cout):
        w = jax.random.normal(k, (cin, cout), jnp.float32) * (1.0 / jnp.sqrt(cin))
        b = jnp.zeros((cout,), jnp.float32)
        return w, b

    wf, bf = dense(ks[0], IMG_C, F_DIM)                      # RGB_Encoder
    wl, bl = dense(ks[1], IMG_C, L_DIM)                      # Label_Encoder
    wg, bg = dense(ks[2], F_DIM + L_DIM, 2 * N_DIM)          # Gaussian_Predictor
    wd, bd = dense(ks[3], FUSE_DIM, D_OUT)                   # Decoder_Fusion
    wo, bo = dense(ks[4], D_OUT, IMG_C)                      # Generator
    return (wf, bf, wl, bl, wg, bg, wd, bd, wo, bo)


def pack_params(params):
    """Pack MXU weights (transposed, bf16) and the small f32 params (encoder
    weights + biases) into two (8/16,128)-aligned buffers resident in VMEM."""
    (wf, bf, wl, bl, wg, bg, wd, bd, wo, bo) = params

    wp = jnp.zeros((_WP_ROWS, _WP_COLS), jnp.bfloat16)
    wp = wp.at[_WG_R:_WG_R + 2 * N_DIM, 0:F_DIM + L_DIM].set(
        wg.T.astype(jnp.bfloat16))
    wp = wp.at[_WD_R:_WD_R + D_OUT, 0:FUSE_DIM].set(wd.T.astype(jnp.bfloat16))
    wp = wp.at[_WO_R:_WO_R + IMG_C, 0:D_OUT].set(wo.T.astype(jnp.bfloat16))

    bp = jnp.zeros((_BP_ROWS, _BP_COLS), jnp.float32)
    bp = bp.at[_ENC_F_R:_ENC_F_R + F_DIM, 0:IMG_C].set(wf.T)
    bp = bp.at[_ENC_F_R:_ENC_F_R + F_DIM, 3].set(bf)
    bp = bp.at[_ENC_L_R:_ENC_L_R + L_DIM, 0:IMG_C].set(wl.T)
    bp = bp.at[_ENC_L_R:_ENC_L_R + L_DIM, 3].set(bl)
    bp = bp.at[_BIAS_R:_BIAS_R + 2 * N_DIM, 0].set(bg)
    bp = bp.at[_BIAS_R:_BIAS_R + D_OUT, 1].set(bd)
    bp = bp.at[_BIAS_R:_BIAS_R + IMG_C, 2].set(bo)
    return wp, bp


def _pick_tile(hw):
    """Return (tile, padded_hw).  Prefer the largest 128-multiple divisor of
    hw (capped at MAX_TILE); if only tiny divisors exist, pad hw instead."""
    best = 0
    for cand in range(128, min(hw, MAX_TILE) + 1, 128):
        if hw % cand == 0:
            best = cand
    if best > 0 and best >= min(1024, hw):
        return best, hw
    tn = min(MAX_TILE, max(128, -(-hw // 128) * 128))
    hw_pad = -(-hw // tn) * tn
    return tn, hw_pad


# --------------------------------- wrapper -----------------------------------
@jax.jit
def vae_forward(img_nchw, lbl_nchw, eps_nchw, wp, bp):
    """img/label: (N, 3, H, W) f32; eps: (N, N_DIM, H, W). Returns (N,3,H,W)."""
    n, c, h, w = img_nchw.shape
    assert c == IMG_C
    hw = h * w
    tn, hw_pad = _pick_tile(hw)

    # Free reshapes (no transposes, no extra HBM traffic).
    img3 = img_nchw.reshape(n, c, hw)
    lbl3 = lbl_nchw.reshape(n, c, hw)
    eps3 = eps_nchw.reshape(n, N_DIM, hw).astype(jnp.bfloat16)

    if hw_pad != hw:
        pad = ((0, 0), (0, 0), (0, hw_pad - hw))
        img3 = jnp.pad(img3, pad)
        lbl3 = jnp.pad(lbl3, pad)
        eps3 = jnp.pad(eps3, pad)

    pix_spec = pl.BlockSpec((1, IMG_C, tn), lambda b, i: (b, 0, i))
    eps_spec = pl.BlockSpec((1, N_DIM, tn), lambda b, i: (b, 0, i))
    wp_spec = pl.BlockSpec((_WP_ROWS, _WP_COLS), lambda b, i: (0, 0))
    bp_spec = pl.BlockSpec((_BP_ROWS, _BP_COLS), lambda b, i: (0, 0))

    out3 = pl.pallas_call(
        vae_forward_kernel,
        out_shape=jax.ShapeDtypeStruct((n, IMG_C, hw_pad), jnp.float32),
        grid_spec=pltpu.PrefetchScalarGridSpec(
            num_scalar_prefetch=0,
            grid=(n, hw_pad // tn),
            in_specs=[pix_spec, pix_spec, eps_spec, wp_spec, bp_spec],
            out_specs=pl.BlockSpec((1, IMG_C, tn), lambda b, i: (b, 0, i)),
            scratch_shapes=[pltpu.VMEM((FUSE_DIM, tn), jnp.bfloat16)],
        ),
        compiler_params=pltpu.CompilerParams(
            dimension_semantics=("parallel", "parallel"),
            vmem_limit_bytes=32 * 1024 * 1024),
    )(img3, lbl3, eps3, wp, bp)

    if hw_pad != hw:
        out3 = out3[..., :hw]
    return out3.reshape(n, IMG_C, h, w)


# ------------------------------ pure-JAX reference ---------------------------
def vae_forward_ref(img, lbl, eps, params):
    """Reference with the same bf16 MXU casts as the kernel."""
    (wf, bf, wl, bl, wg, bg, wd, bd, wo, bo) = params
    n, c, h, w = img.shape
    hw = h * w
    x = img.reshape(n, c, hw)
    y = lbl.reshape(n, c, hw)
    e = eps.reshape(n, N_DIM, hw).astype(jnp.bfloat16).astype(jnp.float32)

    f = jax.nn.relu(jnp.einsum('io,nip->nop', wf, x) + bf[None, :, None])
    l = jax.nn.relu(jnp.einsum('io,nip->nop', wl, y) + bl[None, :, None])
    fl = jnp.concatenate([f, l], axis=1).astype(jnp.bfloat16)
    hg = jnp.einsum('io,nip->nop', wg.astype(jnp.bfloat16), fl,
                    preferred_element_type=jnp.float32) + bg[None, :, None]
    mu, logvar = hg[:, :N_DIM], hg[:, N_DIM:]
    z = mu + jnp.exp(0.5 * logvar) * e
    flz = jnp.concatenate([fl, z.astype(jnp.bfloat16)], axis=1)
    d = jax.nn.relu(
        jnp.einsum('io,nip->nop', wd.astype(jnp.bfloat16), flz,
                   preferred_element_type=jnp.float32) + bd[None, :, None])
    out = jax.nn.sigmoid(
        jnp.einsum('io,nip->nop', wo.astype(jnp.bfloat16),
                   d.astype(jnp.bfloat16),
                   preferred_element_type=jnp.float32) + bo[None, :, None])
    return out.reshape(n, IMG_C, h, w)


if __name__ == "__main__":
    key = jax.random.PRNGKey(0)
    k_img, k_lbl, k_eps, k_par = jax.random.split(key, 4)

    batch, H, W = 2, 32, 32        # 1024 pixels/image -> grid (2, 1)
    img = jax.random.uniform(k_img, (batch, IMG_C, H, W), jnp.float32)
    lbl = jax.random.uniform(k_lbl, (batch, IMG_C, H, W), jnp.float32)
    eps = jax.random.normal(k_eps, (batch, N_DIM, H, W), jnp.float32)

    params = init_params(k_par)
    wp, bp = pack_params(params)

    out = vae_forward(img, lbl, eps, wp, bp)
    jax.block_until_ready(out)

    assert out.shape == (batch, IMG_C, H, W)
    assert bool(jnp.all(jnp.isfinite(out)))
    assert bool(jnp.all((out >= 0.0) & (out <= 1.0)))

    ref = vae_forward_ref(img, lbl, eps, params)
    max_err = float(jnp.max(jnp.abs(out - ref)))
    assert max_err < 2e-2, max_err

    print("KERNEL_OK")
</pallas_src>

<mosaic_0001>
module attributes {stable_mosaic.version = 11 : i64} {
  func.func @vae_forward_kernel(%arg0: i32, %arg1: i32, %arg2: memref<1x3x1024xf32, #tpu.memory_space<vmem>>, %arg3: memref<1x3x1024xf32, #tpu.memory_space<vmem>>, %arg4: memref<1x16x1024xbf16, #tpu.memory_space<vmem>>, %arg5: memref<80x128xbf16, #tpu.memory_space<vmem>>, %arg6: memref<96x128xf32, #tpu.memory_space<vmem>>, %arg7: memref<1x3x1024xf32, #tpu.memory_space<vmem>>, %arg8: memref<80x1024xbf16, #tpu.memory_space<vmem>>) attributes {dimension_semantics = [#tpu.dimension_semantics<parallel>, #tpu.dimension_semantics<parallel>], iteration_bounds = array<i64: 2, 1>, scalar_prefetch = 0 : i64, scratch_operands = 1 : i64, tpu.core_type = #tpu.core_type<tc>, window_params = [{transform_indices = @transform_0, window_bounds = array<i64: 1, 3, 1024>}, {transform_indices = @transform_1, window_bounds = array<i64: 1, 3, 1024>}, {transform_indices = @transform_2, window_bounds = array<i64: 1, 16, 1024>}, {pipeline_mode = #tpu.pipeline_mode<synchronous>, transform_indices = @transform_3, window_bounds = array<i64: 80, 128>}, {pipeline_mode = #tpu.pipeline_mode<synchronous>, transform_indices = @transform_4, window_bounds = array<i64: 96, 128>}, {transform_indices = @transform_5, window_bounds = array<i64: 1, 3, 1024>}]} {
    %c0 = arith.constant 0 : index
    %c0_0 = arith.constant 0 : index
    %c0_1 = arith.constant 0 : index
    %0 = vector.load %arg2[%c0, %c0_0, %c0_1] : memref<1x3x1024xf32, #tpu.memory_space<vmem>>, vector<1x3x1024xf32>
    %1 = vector.shape_cast %0 : vector<1x3x1024xf32> to vector<3x1024xf32>
    %c0_2 = arith.constant 0 : index
    %c0_3 = arith.constant 0 : index
    %c0_4 = arith.constant 0 : index
    %2 = vector.load %arg3[%c0_2, %c0_3, %c0_4] : memref<1x3x1024xf32, #tpu.memory_space<vmem>>, vector<1x3x1024xf32>
    %3 = vector.shape_cast %2 : vector<1x3x1024xf32> to vector<3x1024xf32>
    %c0_5 = arith.constant 0 : index
    %c0_6 = arith.constant 0 : index
    %4 = vector.load %arg6[%c0_5, %c0_6] : memref<96x128xf32, #tpu.memory_space<vmem>>, vector<32x1xf32>
    %c0_7 = arith.constant 0 : index
    %c1 = arith.constant 1 : index
    %5 = vector.load %arg6[%c0_7, %c1] : memref<96x128xf32, #tpu.memory_space<vmem>>, vector<32x1xf32>
    %c0_8 = arith.constant 0 : index
    %c2 = arith.constant 2 : index
    %6 = vector.load %arg6[%c0_8, %c2] : memref<96x128xf32, #tpu.memory_space<vmem>>, vector<32x1xf32>
    %c0_9 = arith.constant 0 : index
    %c3 = arith.constant 3 : index
    %7 = vector.load %arg6[%c0_9, %c3] : memref<96x128xf32, #tpu.memory_space<vmem>>, vector<32x1xf32>
    %8 = vector.extract_strided_slice %1 {offsets = [0, 0], sizes = [1, 1024], strides = [1, 1]} : vector<3x1024xf32> to vector<1x1024xf32>
    %9 = vector.broadcast %4 : vector<32x1xf32> to vector<32x1024xf32>
    %10 = vector.broadcast %8 : vector<1x1024xf32> to vector<32x1024xf32>
    %11 = arith.mulf %9, %10 : vector<32x1024xf32>
    %12 = vector.extract_strided_slice %1 {offsets = [1, 0], sizes = [1, 1024], strides = [1, 1]} : vector<3x1024xf32> to vector<1x1024xf32>
    %13 = vector.broadcast %5 : vector<32x1xf32> to vector<32x1024xf32>
    %14 = vector.broadcast %12 : vector<1x1024xf32> to vector<32x1024xf32>
    %15 = arith.mulf %13, %14 : vector<32x1024xf32>
    %16 = arith.addf %11, %15 : vector<32x1024xf32>
    %17 = vector.extract_strided_slice %1 {offsets = [2, 0], sizes = [1, 1024], strides = [1, 1]} : vector<3x1024xf32> to vector<1x1024xf32>
    %18 = vector.broadcast %6 : vector<32x1xf32> to vector<32x1024xf32>
    %19 = vector.broadcast %17 : vector<1x1024xf32> to vector<32x1024xf32>
    %20 = arith.mulf %18, %19 : vector<32x1024xf32>
    %21 = arith.addf %16, %20 : vector<32x1024xf32>
    %22 = vector.broadcast %7 : vector<32x1xf32> to vector<32x1024xf32>
    %23 = arith.addf %21, %22 : vector<32x1024xf32>
    %cst = arith.constant 0.000000e+00 : f32
    %24 = vector.broadcast %cst : f32 to vector<32x1024xf32>
    %25 = arith.maximumf %23, %24 : vector<32x1024xf32>
    %c32 = arith.constant 32 : index
    %c0_10 = arith.constant 0 : index
    %26 = vector.load %arg6[%c32, %c0_10] : memref<96x128xf32, #tpu.memory_space<vmem>>, vector<32x1xf32>
    %c32_11 = arith.constant 32 : index
    %c1_12 = arith.constant 1 : index
    %27 = vector.load %arg6[%c32_11, %c1_12] : memref<96x128xf32, #tpu.memory_space<vmem>>, vector<32x1xf32>
    %c32_13 = arith.constant 32 : index
    %c2_14 = arith.constant 2 : index
    %28 = vector.load %arg6[%c32_13, %c2_14] : memref<96x128xf32, #tpu.memory_space<vmem>>, vector<32x1xf32>
    %c32_15 = arith.constant 32 : index
    %c3_16 = arith.constant 3 : index
    %29 = vector.load %arg6[%c32_15, %c3_16] : memref<96x128xf32, #tpu.memory_space<vmem>>, vector<32x1xf32>
    %30 = vector.extract_strided_slice %3 {offsets = [0, 0], sizes = [1, 1024], strides = [1, 1]} : vector<3x1024xf32> to vector<1x1024xf32>
    %31 = vector.broadcast %26 : vector<32x1xf32> to vector<32x1024xf32>
    %32 = vector.broadcast %30 : vector<1x1024xf32> to vector<32x1024xf32>
    %33 = arith.mulf %31, %32 : vector<32x1024xf32>
    %34 = vector.extract_strided_slice %3 {offsets = [1, 0], sizes = [1, 1024], strides = [1, 1]} : vector<3x1024xf32> to vector<1x1024xf32>
    %35 = vector.broadcast %27 : vector<32x1xf32> to vector<32x1024xf32>
    %36 = vector.broadcast %34 : vector<1x1024xf32> to vector<32x1024xf32>
    %37 = arith.mulf %35, %36 : vector<32x1024xf32>
    %38 = arith.addf %33, %37 : vector<32x1024xf32>
    %39 = vector.extract_strided_slice %3 {offsets = [2, 0], sizes = [1, 1024], strides = [1, 1]} : vector<3x1024xf32> to vector<1x1024xf32>
    %40 = vector.broadcast %28 : vector<32x1xf32> to vector<32x1024xf32>
    %41 = vector.broadcast %39 : vector<1x1024xf32> to vector<32x1024xf32>
    %42 = arith.mulf %40, %41 : vector<32x1024xf32>
    %43 = arith.addf %38, %42 : vector<32x1024xf32>
    %44 = vector.broadcast %29 : vector<32x1xf32> to vector<32x1024xf32>
    %45 = arith.addf %43, %44 : vector<32x1024xf32>
    %cst_17 = arith.constant 0.000000e+00 : f32
    %46 = vector.broadcast %cst_17 : f32 to vector<32x1024xf32>
    %47 = arith.maximumf %45, %46 : vector<32x1024xf32>
    %48 = arith.truncf %25 : vector<32x1024xf32> to vector<32x1024xbf16>
    %c0_18 = arith.constant 0 : index
    %c0_19 = arith.constant 0 : index
    %49 = vector.load %arg8[%c0_18, %c0_19] : memref<80x1024xbf16, #tpu.memory_space<vmem>>, vector<32x1024xbf16>
    tpu.vector_store %arg8[%c0_18, %c0_19], %48 {strides = array<i32>} : memref<80x1024xbf16, #tpu.memory_space<vmem>>, vector<32x1024xbf16>,
    %50 = arith.truncf %47 : vector<32x1024xf32> to vector<32x1024xbf16>
    %c32_20 = arith.constant 32 : index
    %c0_21 = arith.constant 0 : index
    %51 = vector.load %arg8[%c32_20, %c0_21] : memref<80x1024xbf16, #tpu.memory_space<vmem>>, vector<32x1024xbf16>
    tpu.vector_store %arg8[%c32_20, %c0_21], %50 {strides = array<i32>} : memref<80x1024xbf16, #tpu.memory_space<vmem>>, vector<32x1024xbf16>,
    %c0_22 = arith.constant 0 : index
    %c0_23 = arith.constant 0 : index
    %52 = vector.load %arg5[%c0_22, %c0_23] : memref<80x128xbf16, #tpu.memory_space<vmem>>, vector<32x64xbf16>
    %c64 = arith.constant 64 : index
    %c0_24 = arith.constant 0 : index
    %53 = vector.load %arg6[%c64, %c0_24] : memref<96x128xf32, #tpu.memory_space<vmem>>, vector<32x1xf32>
    %c0_25 = arith.constant 0 : index
    %c0_26 = arith.constant 0 : index
    %54 = vector.load %arg8[%c0_25, %c0_26] : memref<80x1024xbf16, #tpu.memory_space<vmem>>, vector<64x1024xbf16>
    %cst_27 = arith.constant dense<0.000000e+00> : vector<32x1024xf32>
    %55 = tpu.matmul %52, %54, %cst_27 {dimension_numbers = #tpu.dot_dimension_numbers<[1], [0], [0], [1], [0, 0, 1, 1], [], []>} : vector<32x64xbf16>, vector<64x1024xbf16>, vector<32x1024xf32> -> vector<32x1024xf32>
    %56 = vector.broadcast %53 : vector<32x1xf32> to vector<32x1024xf32>
    %57 = arith.addf %55, %56 : vector<32x1024xf32>
    %58 = vector.extract_strided_slice %57 {offsets = [0, 0], sizes = [16, 1024], strides = [1, 1]} : vector<32x1024xf32> to vector<16x1024xf32>
    %59 = vector.extract_strided_slice %57 {offsets = [16, 0], sizes = [16, 1024], strides = [1, 1]} : vector<32x1024xf32> to vector<16x1024xf32>
    %c0_28 = arith.constant 0 : index
    %c0_29 = arith.constant 0 : index
    %c0_30 = arith.constant 0 : index
    %60 = vector.load %arg4[%c0_28, %c0_29, %c0_30] : memref<1x16x1024xbf16, #tpu.memory_space<vmem>>, vector<1x16x1024xbf16>
    %61 = vector.shape_cast %60 : vector<1x16x1024xbf16> to vector<16x1024xbf16>
    %62 = arith.extf %61 : vector<16x1024xbf16> to vector<16x1024xf32>
    %cst_31 = arith.constant 5.000000e-01 : f32
    %63 = vector.broadcast %cst_31 : f32 to vector<16x1024xf32>
    %64 = arith.mulf %63, %59 : vector<16x1024xf32>
    %65 = math.exp %64 : vector<16x1024xf32>
    %66 = arith.mulf %65, %62 : vector<16x1024xf32>
    %67 = arith.addf %58, %66 : vector<16x1024xf32>
    %68 = arith.truncf %67 : vector<16x1024xf32> to vector<16x1024xbf16>
    %c64_32 = arith.constant 64 : index
    %c0_33 = arith.constant 0 : index
    %69 = vector.load %arg8[%c64_32, %c0_33] : memref<80x1024xbf16, #tpu.memory_space<vmem>>, vector<16x1024xbf16>
    tpu.vector_store %arg8[%c64_32, %c0_33], %68 {strides = array<i32>} : memref<80x1024xbf16, #tpu.memory_space<vmem>>, vector<16x1024xbf16>,
    %c32_34 = arith.constant 32 : index
    %c0_35 = arith.constant 0 : index
    %70 = vector.load %arg5[%c32_34, %c0_35] : memref<80x128xbf16, #tpu.memory_space<vmem>>, vector<32x80xbf16>
    %c64_36 = arith.constant 64 : index
    %c1_37 = arith.constant 1 : index
    %71 = vector.load %arg6[%c64_36, %c1_37] : memref<96x128xf32, #tpu.memory_space<vmem>>, vector<32x1xf32>
    %c0_38 = arith.constant 0 : index
    %c0_39 = arith.constant 0 : index
    %72 = vector.load %arg8[%c0_38, %c0_39] : memref<80x1024xbf16, #tpu.memory_space<vmem>>, vector<80x1024xbf16>
    %cst_40 = arith.constant dense<0.000000e+00> : vector<32x1024xf32>
    %73 = tpu.matmul %70, %72, %cst_40 {dimension_numbers = #tpu.dot_dimension_numbers<[1], [0], [0], [1], [0, 0, 1, 1], [], []>} : vector<32x80xbf16>, vector<80x1024xbf16>, vector<32x1024xf32> -> vector<32x1024xf32>
    %74 = vector.broadcast %71 : vector<32x1xf32> to vector<32x1024xf32>
    %75 = arith.addf %73, %74 : vector<32x1024xf32>
    %cst_41 = arith.constant 0.000000e+00 : f32
    %76 = vector.broadcast %cst_41 : f32 to vector<32x1024xf32>
    %77 = arith.maximumf %75, %76 : vector<32x1024xf32>
    %c64_42 = arith.constant 64 : index
    %c0_43 = arith.constant 0 : index
    %78 = vector.load %arg5[%c64_42, %c0_43] : memref<80x128xbf16, #tpu.memory_space<vmem>>, vector<3x32xbf16>
    %c64_44 = arith.constant 64 : index
    %c2_45 = arith.constant 2 : index
    %79 = vector.load %arg6[%c64_44, %c2_45] : memref<96x128xf32, #tpu.memory_space<vmem>>, vector<3x1xf32>
    %80 = arith.truncf %77 : vector<32x1024xf32> to vector<32x1024xbf16>
    %cst_46 = arith.constant dense<0.000000e+00> : vector<3x1024xf32>
    %81 = tpu.matmul %78, %80, %cst_46 {dimension_numbers = #tpu.dot_dimension_numbers<[1], [0], [0], [1], [0, 0, 1, 1], [], []>} : vector<3x32xbf16>, vector<32x1024xbf16>, vector<3x1024xf32> -> vector<3x1024xf32>
    %82 = vector.broadcast %79 : vector<3x1xf32> to vector<3x1024xf32>
    %83 = arith.addf %81, %82 : vector<3x1024xf32>
    %84 = arith.negf %83 : vector<3x1024xf32>
    %85 = math.exp %84 : vector<3x1024xf32>
    %cst_47 = arith.constant 1.000000e+00 : f32
    %86 = vector.broadcast %cst_47 : f32 to vector<3x1024xf32>
    %87 = arith.addf %86, %85 : vector<3x1024xf32>
    %88 = arith.divf %86, %87 : vector<3x1024xf32>
    %c0_48 = arith.constant 0 : index
    %c0_49 = arith.constant 0 : index
    %c0_50 = arith.constant 0 : index
    %89 = vector.load %arg7[%c0_48, %c0_49, %c0_50] : memref<1x3x1024xf32, #tpu.memory_space<vmem>>, vector<1x3x1024xf32>
    %90 = vector.shape_cast %89 : vector<1x3x1024xf32> to vector<3x1024xf32>
    %91 = vector.shape_cast %88 : vector<3x1024xf32> to vector<1x3x1024xf32>
    tpu.vector_store %arg7[%c0_48, %c0_49, %c0_50], %91 {strides = array<i32>} : memref<1x3x1024xf32, #tpu.memory_space<vmem>>, vector<1x3x1024xf32>,
    return
  }
  func.func @transform_0(%arg0: i32, %arg1: i32) -> (i32, i32, i32) {
    %c0_i32 = arith.constant 0 : i32
    %c0_i32_0 = arith.constant 0 : i32
    return %arg0, %c0_i32, %arg1 : i32, i32, i32
  }
  func.func @transform_1(%arg0: i32, %arg1: i32) -> (i32, i32, i32) {
    %c0_i32 = arith.constant 0 : i32
    %c0_i32_0 = arith.constant 0 : i32
    return %arg0, %c0_i32, %arg1 : i32, i32, i32
  }
  func.func @transform_2(%arg0: i32, %arg1: i32) -> (i32, i32, i32) {
    %c0_i32 = arith.constant 0 : i32
    %c0_i32_0 = arith.constant 0 : i32
    return %arg0, %c0_i32, %arg1 : i32, i32, i32
  }
  func.func @transform_3(%arg0: i32, %arg1: i32) -> (i32, i32) {
    %c0_i32 = arith.constant 0 : i32
    %c0_i32_0 = arith.constant 0 : i32
    %c0_i32_1 = arith.constant 0 : i32
    return %c0_i32, %c0_i32_0 : i32, i32
  }
  func.func @transform_4(%arg0: i32, %arg1: i32) -> (i32, i32) {
    %c0_i32 = arith.constant 0 : i32
    %c0_i32_0 = arith.constant 0 : i32
    %c0_i32_1 = arith.constant 0 : i32
    return %c0_i32, %c0_i32_0 : i32, i32
  }
  func.func @transform_5(%arg0: i32, %arg1: i32) -> (i32, i32, i32) {
    %c0_i32 = arith.constant 0 : i32
    %c0_i32_0 = arith.constant 0 : i32
    return %arg0, %c0_i32, %arg1 : i32, i32, i32
  }
}

</mosaic_0001>

<bundles_post_ra>
// kernel: vae_forward.1
= control target key start
LH: loop header
LB: loop body
LE: loop exit
PB: predicated region body
PF: predicated region fallthrough
CT: control target
= control target key end

     0   :  { %s2790_s18 = smov 0   ;;  %s2792_s19 = smov 0   ;;  %s4173_s0 = inlined_call_operand.vmem [shape: f32[2,3,1024], index: 0, kind: input, shape index: {}]   ;;  %s4174_s1 = inlined_call_operand.vmem [shape: f32[2,3,1024], index: 1, kind: input, shape index: {}]   ;;  %s4175_s2 = inlined_call_operand.vmem [shape: bf16[2,16,1024], index: 2, kind: input, shape index: {}]   ;;  %s4176_s3 = inlined_call_operand.vmem [shape: bf16[80,128], index: 3, kind: input, shape index: {}]   ;;  %s4177_s4 = inlined_call_operand.vmem [shape: f32[96,128], index: 4, kind: input, shape index: {}]   ;;  %s4178_s5 = inlined_call_operand.vmem [shape: f32[2,3,1024], index: 5, kind: output, shape index: {}]  }
   0x1   :  { %s2794_s20 = smov 0  }
   0x2 LB: > { %s27_s21 = sadd.s32 1, %s2750_s19  ;;  %p2565_p0 = scmp.ge.s32.totalorder %s2754_s20, 1  ;;  %s2754_s20 = sphi %s2794_s20, %s15_s20   ;;  %s2750_s19 = sphi %s2792_s19, %s4377_s19   ;;  %s2746_s18 = sphi %s2790_s18, %s4376_s18  }
   0x3   : > { %p29_p1 = scmp.ge.s32.totalorder %s27_s21, 2  ;;  %p242_p2 = scmp.lt.s32.totalorder %s2754_s20, 3 }
   0x5   : > { %s4379_s21 = smov (%p29_p1, %s27_s21), 0  ;;  %p243_p3 = pnand %p2565_p0, %p242_p2 }
   0x7   : > { %246 = sbr.rel (%p243_p3) target bundleno = 1007 (0x3ef), region = 40 }
   0xe   : > { %v345_v0 = vld [vmem:[%s4177_s4] sm:$0xff]  ;;  %v4181_v1 = vmov 2   ;;  %v4183_v2 = vmov 1   ;;  %v347_v3 = vld [vmem:[%s4177_s4 + $0x10] sm:$0xff]  ;;  %v346_v4 = vld [vmem:[%s4177_s4 + $0x8] sm:$0xff]  ;;  %v4179_v5 = vmov 0   ;;  %v373_v12 = vlaneseq }
   0xf   : > { %2641 = vset.pattern.permute.xlu0 %v4181_v1  ;;  %2640 = vset.pattern.permute.xlu1 %v4183_v2  ;;  %v348_v6 = vld [vmem:[%s4177_s4 + $0x18] sm:$0xff]  ;;  %v863_v7 = vld [vmem:[%s4177_s4 + $0x30] sm:$0xff]  ;;  %v861_v8 = vld [vmem:[%s4177_s4 + $0x20] sm:$0xff]  ;;  %v2759_v10 = vmov 3   ;;  %p297_p4 = scmp.lt.s32.totalorder %s2746_s18, 1  ;;  %vm1511_vm0 = vcmask 523264  }
  0x10   : > { %630 = vperm.xlu0 %2641, %v345_v0   ;;  %478 = vperm.xlu1 %2640, %v345_v0   ;;  %v864_v9 = vld [vmem:[%s4177_s4 + $0x38] sm:$0xff]  ;;  %v862_v11 = vld [vmem:[%s4177_s4 + $0x28] sm:$0xff]  ;;  %v374_v13 = vshrl.u32 %v373_v12, 7  ;;  %vm1928_vm1 = vcmask 654336   ;;  %vm2202_vm2 = vcmask 261120  }
  0x11   : > { %1550 = vmatprep.mubr.bf16.mxu0 %v4179_v5  ;;  %1603 = vmatprep.mubr.bf16.mxu1 %v4179_v5  ;;  %s4381_s18 = smov (!%p297_p4, %s2746_s18), 1 }
  0x12   : > { %s2857_s13 = sshll.u32 %s4381_s18, 5  ;;  %v2863_v14 = vsub.s32 4, %v374_v13  ;;  %v2865_v15 = vsub.s32 5, %v374_v13  ;;  %v2867_v16 = vsub.s32 6, %v374_v13  ;;  %v2869_v18 = vsub.s32 0, %v374_v13  ;;  %s2610_s11 = sshll.u32 %s4381_s18, 6 }
  0x13   : > { %s304_s16 = scalar_lea.vmem %s4173_s0, %s2857_s13  ;;  %v2871_v19 = vsub.s32 1, %v374_v13  ;;  %v2873_v20 = vsub.s32 2, %v374_v13  ;;  %s2904_s23 = scalar_lea.vmem %s4174_s1, %s2857_s13 }
  0x14   : > { %638 = vperm.xlu0 %2641, %v347_v3   ;;  %482 = vperm.xlu1 %2640, %v346_v4   ;;  %v337_v17 = vld [vmem:[%s304_s16] sm:$0x77]  ;;  %v338_v21 = vld [vmem:[%s304_s16 + $0x8] sm:$0x77]  ;;  %v339_v25 = vld [vmem:[%s304_s16 + $0x10] sm:$0x77]  ;;  %s3976_s15 = scalar_lea.vmem %s4175_s2, %s2610_s11  ;;  %s4158_s29 = scalar_lea.vmem %s4178_s5, %s2857_s13 }
  0x15   : > { %4245 = vst [vmem:[#allocation3_spill] sm:$0xff] %v2873_v20  ;;  %v380_v22 = vrot.slane %v337_v17, %v2863_v14  ;;  %v500_v23 = vrot.slane %v337_v17, %v2865_v15  ;;  %v652_v24 = vrot.slane %v337_v17, %v2867_v16  ;;  %v388_v26 = vrot.slane %v338_v21, %v2863_v14  ;;  %v2882_v30 = vld [vmem:[%s304_s16 + $0x18] sm:$0x77]  ;;  %v341_v51 = vld [vmem:[%s2904_s23] sm:$0x77] }
  0x16   : > { %v508_v27 = vrot.slane %v338_v21, %v2865_v15  ;;  %v660_v28 = vrot.slane %v338_v21, %v2867_v16  ;;  %v376_v29 = vrot.slane %v337_v17, %v2869_v18  ;;  %v496_v31 = vrot.slane %v337_v17, %v2871_v19  ;;  %v342_v52 = vld [vmem:[%s2904_s23 + $0x8] sm:$0x77] }
  0x17   : > { %v648_v32 = vrot.slane %v337_v17, %v2873_v20  ;;  %v384_v33 = vrot.slane %v338_v21, %v2869_v18  ;;  %v504_v34 = vrot.slane %v338_v21, %v2871_v19  ;;  %v656_v35 = vrot.slane %v338_v21, %v2873_v20 }
  0x18   : > { %2645 = vset.pattern.permute.xlu0 %v4179_v5  ;;  %2642 = vset.pattern.permute.xlu1 %v4181_v1  ;;  %v396_v36 = vrot.slane %v339_v25, %v2863_v14  ;;  %v516_v37 = vrot.slane %v339_v25, %v2865_v15  ;;  %v2892_v38 = vrot.slane %v380_v22, %v2869_v18 }
  0x19   : > { %351 = vperm.xlu0 %2645, %v345_v0   ;;  %634 = vperm.xlu1 %2642, %v346_v4   ;;  %v2895_v39 = vrot.slane %v500_v23, %v2871_v19  ;;  %v2898_v40 = vrot.slane %v652_v24, %v2873_v20  ;;  %v524_v41 = vrot.slane %v2882_v30, %v2865_v15 }
  0x1a   : > { %v2909_v42 = vrot.slane %v388_v26, %v2869_v18  ;;  %v2912_v43 = vrot.slane %v508_v27, %v2871_v19  ;;  %v2915_v44 = vrot.slane %v660_v28, %v2873_v20  ;;  %v2918_v45 = vrot.slane %v376_v29, %v2869_v18  ;;  %v343_v29 = vld [vmem:[%s2904_s23 + $0x10] sm:$0x77] }
  0x1b   : > { %v2921_v46 = vrot.slane %v496_v31, %v2871_v19  ;;  %v2924_v47 = vrot.slane %v648_v32, %v2873_v20  ;;  %v2927_v48 = vrot.slane %v384_v33, %v2869_v18  ;;  %v2930_v49 = vrot.slane %v504_v34, %v2871_v19  ;;  %v3004_v31 = vld [vmem:[%s2904_s23 + $0x18] sm:$0x77] }
  0x1c   : > { %v2933_v50 = vrot.slane %v656_v35, %v2873_v20  ;;  %v2938_v53 = vrot.slane %v396_v36, %v2869_v18  ;;  %v2941_v54 = vrot.slane %v516_v37, %v2871_v19  ;;  %v668_v55 = vrot.slane %v339_v25, %v2867_v16  ;;  %4255 = vst [vmem:[#allocation13_spill] sm:$0xff] %v3004_v31 }
  0x1d   : > { %356 = vperm.xlu0 %2645, %v346_v4   ;;  %2643 = vset.pattern.permute.xlu1 %v4179_v5  ;;  %v404_v56 = vrot.slane %v2882_v30, %v2863_v14  ;;  %v2947_v57 = vrot.slane %v524_v41, %v2871_v19  ;;  %v676_v58 = vrot.slane %v2882_v30, %v2867_v16 }
  0x1e   : > { %361 = vperm.xlu1 %2643, %v347_v3   ;;  %4246 = vst [vmem:[#allocation4_spill] sm:$0xff] %v2941_v54  ;;  %v512_v59 = vrot.slane %v339_v25, %v2871_v19  ;;  %v392_v60 = vrot.slane %v339_v25, %v2869_v18  ;;  %v664_v61 = vrot.slane %v339_v25, %v2873_v20 }
  0x1f   : > { %4247 = vst [vmem:[#allocation5_spill] sm:$0xff] %v2947_v57  ;;  %v400_v62 = vrot.slane %v2882_v30, %v2869_v18  ;;  %v520_v63 = vrot.slane %v2882_v30, %v2871_v19  ;;  %v2970_v12 = vrot.slane %v404_v56, %v2869_v18  ;;  %v2973_v13 = vrot.slane %v676_v58, %v2873_v20 }
  0x20   : > { %v2976_v17 = vrot.slane %v512_v59, %v2871_v19  ;;  %v2979_v21 = vrot.slane %v392_v60, %v2869_v18  ;;  %v2982_v22 = vrot.slane %v664_v61, %v2873_v20  ;;  %v672_v35 = vrot.slane %v2882_v30, %v2873_v20 }
  0x21   : > { %366 = vperm.xlu0 %2645, %v348_v6   ;;  %4249 = vst [vmem:[#allocation7_spill] sm:$0xff] %v2973_v13  ;;  %v2985_v23 = vrot.slane %v400_v62, %v2869_v18  ;;  %v2988_v24 = vrot.slane %v520_v63, %v2871_v19  ;;  %v1168_v36 = vrot.slane %v341_v51, %v2867_v16 }
  0x22   : > { %2644 = vset.pattern.permute.xlu1 %v4183_v2  ;;  %4250 = vst [vmem:[#allocation8_spill] sm:$0xff] %v2976_v17  ;;  %4251 = vst [vmem:[#allocation9_spill] sm:$0xff] %v2979_v21  ;;  %v1176_v37 = vrot.slane %v342_v52, %v2867_v16  ;;  %v1164_v41 = vrot.slane %v341_v51, %v2873_v20  ;;  %v1172_v56 = vrot.slane %v342_v52, %v2873_v20 }
  0x23   : > { %486 = vperm.xlu1 %2644, %v347_v3   ;;  %4252 = vst [vmem:[#allocation10_spill] sm:$0xff] %v2982_v22  ;;  %4253 = vst [vmem:[#allocation11_spill] sm:$0xff] %v2985_v23  ;;  %v912_v58 = vrot.slane %v343_v29, %v2863_v14  ;;  %v1032_v59 = vrot.slane %v343_v29, %v2865_v15  ;;  %v920_v60 = vrot.slane %v3004_v31, %v2863_v14 }
  0x24   : > { %4254 = vst [vmem:[#allocation12_spill] sm:$0xff] %v2988_v24  ;;  %v1040_v30 = vrot.slane %v3004_v31, %v2865_v15  ;;  %v908_v61 = vrot.slane %v343_v29, %v2869_v18  ;;  %v1028_v62 = vrot.slane %v343_v29, %v2871_v19  ;;  %v1184_v63 = vrot.slane %v343_v29, %v2867_v16 }
  0x25   : > { %877 = vperm.xlu0 %2645, %v863_v7  }
  0x27   : > { %490 = vperm.xlu1 %2644, %v348_v6  }
  0x29   : > { %2652 = vset.pattern.permute.xlu0 %v4183_v2 }
  0x2a   : > { %994 = vperm.xlu0 %2652, %v861_v8  }
  0x2b   : > { %2646 = vset.pattern.permute.xlu1 %v4181_v1 }
  0x2c   : > { %642 = vperm.xlu1 %2646, %v348_v6  }
  0x2e   : > { %1006 = vperm.xlu0 %2652, %v864_v9  }
  0x30   : > { %2647 = vset.pattern.permute.xlu1 %v2759_v10 }
  0x31   : > { %782 = vperm.xlu1 %2647, %v345_v0   ;;  %v896_v0 = vrot.slane %v341_v51, %v2863_v14 }
  0x32   : > { %2655 = vset.pattern.permute.xlu0 %v2759_v10 }
  0x33   : > { %786 = vperm.xlu0 %2655, %v346_v4   ;;  %v904_v4 = vrot.slane %v342_v52, %v2863_v14  ;;  %v2991_v25 = vrot.slane %v896_v0, %v2869_v18  ;;  %v1180_v0 = vrot.slane %v343_v29, %v2873_v20  ;;  %v1036_v14 = vrot.slane %v3004_v31, %v2871_v19 }
  0x35   : > { %2648 = vset.pattern.permute.xlu1 %v4179_v5  ;;  %v2997_v27 = vrot.slane %v904_v4, %v2869_v18  ;;  %v3047_v4 = vrot.slane %v1164_v41, %v2873_v20 }
  0x36   : > { %867 = vperm.xlu1 %2648, %v861_v8  }
  0x37   : > { %794 = vperm.xlu0 %2655, %v348_v6   ;;  %v1024_v6 = vrot.slane %v342_v52, %v2865_v15  ;;  %4259 = vst [vmem:[#allocation17_spill] sm:$0xff] %v3047_v4 }
  0x39   : > { %v3000_v28 = vrot.slane %v1024_v6, %v2871_v19  ;;  %v3050_v6 = vrot.slane %v672_v35, %v2873_v20  ;;  %v3068_v35 = vrot.slane %v908_v61, %v2869_v18 }
  0x3a   : > { %872 = vperm.xlu1 %2648, %v862_v11  }
  0x3b   : > { %1298 = vperm.xlu0 %2655, %v861_v8   ;;  %4260 = vst [vmem:[#allocation18_spill] sm:$0xff] %v3050_v6  ;;  %4266 = vst [vmem:[#allocation24_spill] sm:$0xff] %v3068_v35 }
  0x3e   : > { %2649 = vset.pattern.permute.xlu1 %v4183_v2 }
  0x3f   : > { %998 = vperm.xlu1 %2649, %v862_v11   ;;  %1310 = vperm.xlu0 %2655, %v864_v9  }
  0x43   : > { %2650 = vset.pattern.permute.xlu1 %v2759_v10  ;;  %2659 = vset.pattern.permute.xlu0 %v4179_v5 }
  0x44   : > { %790 = vperm.xlu1 %2650, %v347_v3   ;;  %v1016_v3 = vrot.slane %v341_v51, %v2865_v15  ;;  %v3044_v15 = vrot.slane %v1176_v37, %v2873_v20  ;;  %v3071_v37 = vrot.slane %v1028_v62, %v2871_v19 }
  0x46   : > { %v2994_v26 = vrot.slane %v1016_v3, %v2871_v19  ;;  %v3041_v3 = vrot.slane %v1168_v36, %v2873_v20  ;;  %4258 = vst [vmem:[#allocation16_spill] sm:$0xff] %v3044_v15  ;;  %v3065_v36 = vrot.slane %v1040_v30, %v2871_v19  ;;  %4267 = vst [vmem:[#allocation25_spill] sm:$0xff] %v3071_v37 }
  0x48   : > { %2651 = vset.pattern.permute.xlu1 %v4181_v1  ;;  %4257 = vst [vmem:[#allocation15_spill] sm:$0xff] %v3041_v3  ;;  %4265 = vst [vmem:[#allocation23_spill] sm:$0xff] %v3065_v36 }
  0x49   : > { %1146 = vperm.xlu1 %2651, %v861_v8   ;;  %v1012_v8 = vrot.slane %v341_v51, %v2871_v19 }
  0x4b   : > { %v3010_v33 = vrot.slane %v1012_v8, %v2871_v19  ;;  %v3059_v8 = vrot.slane %v1032_v59, %v2871_v19  ;;  %v3083_v59 = vrot.slane %v1180_v0, %v2873_v20 }
  0x4d   : > { %1150 = vperm.xlu1 %2651, %v862_v11   ;;  %4263 = vst [vmem:[#allocation21_spill] sm:$0xff] %v3059_v8  ;;  %4271 = vst [vmem:[#allocation29_spill] sm:$0xff] %v3083_v59 }
  0x51   : > { %2653 = vset.pattern.permute.xlu1 %v4179_v5 }
  0x52   : > { %882 = vperm.xlu1 %2653, %v864_v9  }
  0x56   : > { %2654 = vset.pattern.permute.xlu1 %v4183_v2 }
  0x57   : > { %1002 = vperm.xlu1 %2654, %v863_v7  }
  0x5b   : > { %2656 = vset.pattern.permute.xlu1 %v4181_v1 }
  0x5c   : > { %1154 = vperm.xlu1 %2656, %v863_v7  }
  0x60   : > { %1158 = vperm.xlu1 %2656, %v864_v9   ;;  %v900_v9 = vrot.slane %v342_v52, %v2869_v18 }
  0x62   : > { %v3013_v34 = vrot.slane %v900_v9, %v2869_v18  ;;  %v3062_v9 = vrot.slane %v920_v60, %v2869_v18  ;;  %v3086_v60 = vrot.slane %v1036_v14, %v2871_v19 }
  0x64   : > { %2657 = vset.pattern.permute.xlu1 %v2759_v10  ;;  %v2966_v10 = vrot.slane %v668_v55, %v2873_v20  ;;  %4264 = vst [vmem:[#allocation22_spill] sm:$0xff] %v3062_v9  ;;  %4272 = vst [vmem:[#allocation30_spill] sm:$0xff] %v3086_v60 }
  0x65   : > { %1302 = vperm.xlu1 %2657, %v862_v11   ;;  %v1020_v11 = vrot.slane %v342_v52, %v2871_v19  ;;  %v1192_v52 = vrot.slane %v3004_v31, %v2867_v16  ;;  %v3056_v16 = vrot.slane %v912_v58, %v2869_v18 }
  0x66   : > { %4248 = vst [vmem:[#allocation6_spill] sm:$0xff] %v2966_v10 }
  0x67   : > { %v3021_v55 = vrot.slane %v1020_v11, %v2871_v19  ;;  %4262 = vst [vmem:[#allocation20_spill] sm:$0xff] %v3056_v16  ;;  %v3080_v58 = vrot.slane %v1192_v52, %v2873_v20 }
  0x69   : > { %1306 = vperm.xlu1 %2657, %v863_v7   ;;  %v892_v7 = vrot.slane %v341_v51, %v2869_v18  ;;  %4256 = vst [vmem:[#allocation14_spill] sm:$0xff] %v3021_v55  ;;  %v916_v51 = vrot.slane %v3004_v31, %v2869_v18  ;;  %4270 = vst [vmem:[#allocation28_spill] sm:$0xff] %v3080_v58 }
  0x6b   : > { %v3007_v32 = vrot.slane %v892_v7, %v2869_v18  ;;  %v3053_v7 = vrot.slane %v1172_v56, %v2873_v20  ;;  %v3074_v41 = vrot.slane %v916_v51, %v2869_v18  ;;  %v3077_v56 = vrot.slane %v1184_v63, %v2873_v20 }
  0x6d   : > { %2658 = vset.pattern.permute.xlu1 %v4179_v5  ;;  %4261 = vst [vmem:[#allocation19_spill] sm:$0xff] %v3053_v7  ;;  %4268 = vst [vmem:[#allocation26_spill] sm:$0xff] %v3074_v41 }
  0x6e   : > { %4269 = vst [vmem:[#allocation27_spill] sm:$0xff] %v3077_v56 }
  0x8f   : > { %v479_v11 = vpop.permute.xlu1 %478  ;;  %v631_v29 = vpop.permute.xlu0 %630 }
  0x90   : > { %v566_v30 = vmul.f32 %v2895_v39, %v479_v11  ;;  %v718_v61 = vmul.f32 %v2898_v40, %v631_v29  ;;  %v568_v62 = vmul.f32 %v2912_v43, %v479_v11  ;;  %v720_v51 = vmul.f32 %v2915_v44, %v631_v29 }
  0x91   : > { %v565_v63 = vmul.f32 %v2921_v46, %v479_v11  ;;  %v717_v52 = vmul.f32 %v2924_v47, %v631_v29  ;;  %v567_v0 = vmul.f32 %v2930_v49, %v479_v11  ;;  %v719_v14 = vmul.f32 %v2933_v50, %v631_v29 }
  0x92   : > { %v3099_v1 = vmul.f32 %v2941_v54, %v479_v11  ;;  %v3102_v2 = vmul.f32 %v2966_v10, %v631_v29  ;;  %v3105_v18 = vmul.f32 %v2947_v57, %v479_v11  ;;  %v3108_v60 = vmul.f32 %v2973_v13, %v631_v29 }
  0x93   : > { %v483_v5 = vpop.permute.xlu1 %482  ;;  %v639_v19 = vpop.permute.xlu0 %638  ;;  %v3111_v41 = vmul.f32 %v2976_v17, %v479_v11  ;;  %v3114_v59 = vmul.f32 %v2982_v22, %v631_v29  ;;  %v3117_v37 = vmul.f32 %v2988_v24, %v479_v11  ;;  %v3123_v31 = vmul.f32 %v3050_v6, %v631_v29 }
  0x94   : > { %v574_v35 = vmul.f32 %v2895_v39, %v483_v5  ;;  %v576_v58 = vmul.f32 %v2912_v43, %v483_v5  ;;  %v573_v36 = vmul.f32 %v2921_v46, %v483_v5  ;;  %v575_v20 = vmul.f32 %v2930_v49, %v483_v5 }
  0x95   : > { %4273 = vst [vmem:[#allocation31_spill] sm:$0xff] %v3111_v41  ;;  %4274 = vst [vmem:[#allocation32_spill] sm:$0xff] %v3114_v59  ;;  %v3127_v9 = vmul.f32 %v2898_v40, %v639_v19  ;;  %v3130_v56 = vmul.f32 %v2915_v44, %v639_v19  ;;  %v3133_v11 = vmul.f32 %v2924_v47, %v639_v19 }
  0x96   : > { %4275 = vst [vmem:[#allocation33_spill] sm:$0xff] %v3117_v37  ;;  %4276 = vst [vmem:[#allocation34_spill] sm:$0xff] %v3123_v31  ;;  %v3136_v8 = vmul.f32 %v2933_v50, %v639_v19  ;;  %v3139_v16 = vmul.f32 %v2941_v54, %v483_v5  ;;  %v3142_v29 = vmul.f32 %v2947_v57, %v483_v5 }
  0x97   : > { %v3145_v7 = vmul.f32 %v2976_v17, %v483_v5  ;;  %v3152_v3 = vmul.f32 %v2988_v24, %v483_v5  ;;  %v3155_v31 = vmul.f32 %v2966_v10, %v639_v19  ;;  %v3158_v37 = vmul.f32 %v2973_v13, %v639_v19 }
  0x98   : > { %v3147_v4 = vpop.permute.xlu0 %351  ;;  %v3149_v15 = vpop.permute.xlu1 %634  ;;  %v3161_v54 = vmul.f32 %v2982_v22, %v639_v19  ;;  %v3170_v5 = vmul.f32 %v3050_v6, %v639_v19 }
  0x99   : > { %4277 = vst [vmem:[#allocation35_spill] sm:$0xff] %v3145_v7  ;;  %4278 = vst [vmem:[#allocation36_spill] sm:$0xff] %v3147_v4  ;;  %v446_v17 = vmul.f32 %v2892_v38, %v3147_v4  ;;  %v726_v57 = vmul.f32 %v2898_v40, %v3149_v15  ;;  %v448_v23 = vmul.f32 %v2909_v42, %v3147_v4 }
  0x9a   : > { %4279 = vst [vmem:[#allocation37_spill] sm:$0xff] %v3152_v3  ;;  %4280 = vst [vmem:[#allocation38_spill] sm:$0xff] %v3155_v31  ;;  %v728_v24 = vmul.f32 %v2915_v44, %v3149_v15  ;;  %v447_v31 = vmul.f32 %v2927_v48, %v3147_v4  ;;  %v727_v22 = vmul.f32 %v2933_v50, %v3149_v15 }
  0x9b   : > { %4281 = vst [vmem:[#allocation39_spill] sm:$0xff] %v3158_v37  ;;  %4282 = vst [vmem:[#allocation40_spill] sm:$0xff] %v3161_v54  ;;  %v445_v37 = vmul.f32 %v2918_v45, %v3147_v4  ;;  %v725_v54 = vmul.f32 %v2924_v47, %v3149_v15  ;;  %v598_v3 = vadd.f32 %v566_v30, %v446_v17 }
  0x9c   : > { %4283 = vst [vmem:[#allocation41_spill] sm:$0xff] %v3170_v5  ;;  %v600_v59 = vadd.f32 %v568_v62, %v448_v23  ;;  %v450_v19 = vmul.f32 %v2938_v53, %v3147_v4  ;;  %v3184_v5 = vpop.permute.xlu0 %356  ;;  %v599_v7 = vadd.f32 %v567_v0, %v447_v31  ;;  %v3188_v41 = vmul.f32 %v2966_v10, %v3149_v15 }
  0x9d   : > { %v597_v6 = vadd.f32 %v565_v63, %v445_v37  ;;  %v452_v55 = vmul.f32 %v2970_v12, %v3147_v4  ;;  %v3192_v21 = vpop.permute.xlu1 %361  ;;  %v454_v17 = vmul.f32 %v2892_v38, %v3184_v5  ;;  %v3196_v23 = vadd.f32 %v718_v61, %v598_v3 }
  0x9e   : > { %v456_v30 = vmul.f32 %v2909_v42, %v3184_v5  ;;  %v3202_v31 = vmul.f32 %v2973_v13, %v3149_v15  ;;  %v3204_v37 = vadd.f32 %v720_v51, %v600_v59  ;;  %v453_v62 = vmul.f32 %v2918_v45, %v3184_v5 }
  0x9f   : > { %4284 = vst [vmem:[#allocation42_spill] sm:$0xff] %v3196_v23  ;;  %v3208_v63 = vadd.f32 %v717_v52, %v597_v6  ;;  %v455_v0 = vmul.f32 %v2927_v48, %v3184_v5  ;;  %v606_v10 = vadd.f32 %v574_v35, %v454_v17  ;;  %v3212_v61 = vadd.f32 %v719_v14, %v599_v7 }
  0xa0   : > { %v608_v3 = vadd.f32 %v576_v58, %v456_v30  ;;  %v462_v23 = vmul.f32 %v2892_v38, %v3192_v21  ;;  %v3216_v4 = vpop.permute.xlu0 %366  ;;  %v605_v13 = vadd.f32 %v573_v36, %v453_v62  ;;  %v464_v51 = vmul.f32 %v2909_v42, %v3192_v21  ;;  %v1448_v62 = vld [vmem:[%s4177_s4 + $0x58] sm:$0xff] }
  0xa1   : > { %4285 = vst [vmem:[#allocation43_spill] sm:$0xff] %v3208_v63  ;;  %4286 = vst [vmem:[#allocation44_spill] sm:$0xff] %v3216_v4  ;;  %v607_v59 = vadd.f32 %v575_v20, %v455_v0  ;;  %v461_v6 = vmul.f32 %v2918_v45, %v3192_v21  ;;  %v3222_v52 = vadd.f32 %v726_v57, %v606_v10  ;;  %1498 = vperm.xlu0 %2659, %v1448_v62  }
  0xa2   : > { %v3224_v63 = vadd.f32 %v728_v24, %v608_v3  ;;  %v470_v7 = vmul.f32 %v2892_v38, %v3216_v4  ;;  %v463_v35 = vmul.f32 %v2927_v48, %v3192_v21  ;;  %v3230_v58 = vpop.permute.xlu1 %486  ;;  %v3232_v36 = vadd.f32 %v725_v54, %v605_v13  ;;  %v3251_v13 = vld [vmem:[%s4177_s4 + $0x50] sm:$0xff] }
  0xa3   : > { %4287 = vst [vmem:[#allocation45_spill] sm:$0xff] %v3230_v58  ;;  %v3234_v20 = vadd.f32 %v727_v22, %v607_v59  ;;  %v472_v14 = vmul.f32 %v2909_v42, %v3216_v4  ;;  %v469_v57 = vmul.f32 %v2918_v45, %v3216_v4  ;;  %v582_v10 = vmul.f32 %v2895_v39, %v3230_v58 }
  0xa4   : > { %v584_v38 = vmul.f32 %v2912_v43, %v3230_v58  ;;  %v581_v24 = vmul.f32 %v2921_v46, %v3230_v58  ;;  %v583_v54 = vmul.f32 %v2930_v49, %v3230_v58  ;;  %v3253_v42 = vpop.permute.xlu0 %877  ;;  %v471_v45 = vmul.f32 %v2927_v48, %v3216_v4  ;;  %1493 = vperm.xlu1 %2658, %v3251_v13   ;;  %v1445_v48 = vld [vmem:[%s4177_s4 + $0x40] sm:$0xff] }
  0xa5   : > { %4288 = vst [vmem:[#allocation46_spill] sm:$0xff] %v3253_v42  ;;  %v458_v22 = vmul.f32 %v2938_v53, %v3184_v5  ;;  %v602_v17 = vadd.f32 %v3099_v1, %v450_v19  ;;  %v604_v30 = vadd.f32 %v3105_v18, %v452_v55  ;;  %v614_v0 = vadd.f32 %v582_v10, %v462_v23 }
  0xa6   : > { %v616_v3 = vadd.f32 %v584_v38, %v464_v51  ;;  %v613_v59 = vadd.f32 %v581_v24, %v461_v6  ;;  %v615_v58 = vadd.f32 %v583_v54, %v463_v35  ;;  %v3268_v4 = vpop.permute.xlu1 %490  ;;  %v3272_v1 = vmul.f32 %v2991_v25, %v3253_v42 }
  0xa7   : > { %v3276_v55 = vmul.f32 %v2997_v27, %v3253_v42  ;;  %v3280_v18 = vmul.f32 %v3007_v32, %v3253_v42  ;;  %v460_v19 = vmul.f32 %v2970_v12, %v3184_v5  ;;  %v590_v23 = vmul.f32 %v2895_v39, %v3268_v4 }
  0xa8   : > { %4289 = vst [vmem:[#allocation47_spill] sm:$0xff] %v3272_v1  ;;  %v3287_v51 = vadd.f32 %v3127_v9, %v614_v0  ;;  %v592_v6 = vmul.f32 %v2912_v43, %v3268_v4  ;;  %v3293_v35 = vmul.f32 %v3013_v34, %v3253_v42  ;;  %v3296_v10 = vadd.f32 %v3130_v56, %v616_v3 }
  0xa9   : > { %4290 = vst [vmem:[#allocation48_spill] sm:$0xff] %v3276_v55  ;;  %4291 = vst [vmem:[#allocation49_spill] sm:$0xff] %v3280_v18  ;;  %v589_v38 = vmul.f32 %v2921_v46, %v3268_v4  ;;  %v3301_v24 = vadd.f32 %v3133_v11, %v613_v59  ;;  %v591_v39 = vmul.f32 %v2930_v49, %v3268_v4  ;;  %1483 = vperm.xlu1 %2658, %v1445_v48   ;;  %v3305_v9 = vpop.permute.xlu0 %994  ;;  %v1446_v46 = vld [vmem:[%s4177_s4 + $0x48] sm:$0xff]  ;;  %v4294_v11 = vmov 1   ;;  %v4305_v18 = vld [vmem:[#allocation11_spill] sm:$0xff] }
  0xaa   : > { %4292 = vst [vmem:[#allocation50_spill] sm:$0xff] %v3293_v35  ;;  %4293 = vst [vmem:[#allocation51_spill] sm:$0xff] %v3305_v9  ;;  %v622_v43 = vadd.f32 %v590_v23, %v470_v7  ;;  %v3308_v54 = vadd.f32 %v3136_v8, %v615_v58  ;;  %v610_v0 = vadd.f32 %v3139_v16, %v458_v22  ;;  %2660 = vset.pattern.permute.xlu0 %v4294_v11  ;;  %v4306_v55 = vmov 2  }
  0xab   : > { %v754_v56 = vadd.f32 %v3102_v2, %v602_v17  ;;  %v624_v3 = vadd.f32 %v592_v6, %v472_v14  ;;  %v621_v59 = vadd.f32 %v589_v38, %v469_v57  ;;  %v623_v49 = vadd.f32 %v591_v39, %v471_v45  ;;  %1900 = vperm.xlu0 %2660, %v1445_v48   ;;  %v3320_v8 = vpop.permute.xlu1 %642  ;;  %v4298_v38 = vld [vmem:[#allocation14_spill] sm:$0xff] }
  0xac   : > { %v3318_v42 = vmul.f32 %v2994_v26, %v3305_v9  ;;  %v3324_v16 = vmul.f32 %v3000_v28, %v3305_v9  ;;  %v3328_v2 = vmul.f32 %v3010_v33, %v3305_v9  ;;  %v762_v7 = vadd.f32 %v3188_v41, %v610_v0 }
  0xad   : > { %v612_v58 = vadd.f32 %v3142_v29, %v460_v19  ;;  %v742_v14 = vmul.f32 %v2898_v40, %v3320_v8  ;;  %v744_v57 = vmul.f32 %v2915_v44, %v3320_v8  ;;  %v741_v45 = vmul.f32 %v2924_v47, %v3320_v8  ;;  %1488 = vperm.xlu1 %2658, %v1446_v46   ;;  %v3340_v17 = vpop.permute.xlu0 %1006  ;;  %v4296_v29 = vld [vmem:[#allocation36_spill] sm:$0xff]  ;;  %v4297_v19 = vld [vmem:[#allocation9_spill] sm:$0xff] }
  0xae   : > { %v743_v22 = vmul.f32 %v2933_v50, %v3320_v8  ;;  %4295 = vst [vmem:[#allocation52_spill] sm:$0xff] %v3340_v17  ;;  %v756_v48 = vadd.f32 %v3108_v60, %v604_v30  ;;  %v449_v40 = vmul.f32 %v4297_v19, %v4296_v29  ;;  %v457_v44 = vmul.f32 %v4297_v19, %v3184_v5 }
  0xaf   : > { %v3344_v41 = vadd.f32 %v3202_v31, %v612_v58  ;;  %v774_v23 = vadd.f32 %v742_v14, %v622_v43  ;;  %v776_v6 = vadd.f32 %v744_v57, %v624_v3  ;;  %v773_v47 = vadd.f32 %v741_v45, %v621_v59  ;;  %1915 = vperm.xlu0 %2660, %v1448_v62   ;;  %v4299_v62 = vld [vmem:[#allocation31_spill] sm:$0xff]  ;;  %v4301_v58 = vld [vmem:[#allocation10_spill] sm:$0xff] }
  0xb0   : > { %v3352_v50 = vmul.f32 %v4298_v38, %v3305_v9  ;;  %v775_v39 = vadd.f32 %v743_v22, %v623_v49  ;;  %v3356_v60 = vmul.f32 %v2994_v26, %v3340_v17  ;;  %v3360_v31 = vmul.f32 %v3000_v28, %v3340_v17  ;;  %v3366_v43 = vpop.permute.xlu1 %782  ;;  %v4300_v59 = vld [vmem:[#allocation35_spill] sm:$0xff]  ;;  %v4302_v57 = vld [vmem:[#allocation42_spill] sm:$0xff] }
  0xb1   : > { %v3364_v30 = vmul.f32 %v3010_v33, %v3340_v17  ;;  %v3370_v0 = vmul.f32 %v4298_v38, %v3340_v17  ;;  %v601_v3 = vadd.f32 %v4299_v62, %v449_v40  ;;  %v609_v49 = vadd.f32 %v4300_v59, %v457_v44  ;;  %2661 = vset.pattern.permute.xlu1 %v4294_v11  ;;  %v4303_v9 = vld [vmem:[#allocation43_spill] sm:$0xff]  ;;  %v4304_v62 = vld [vmem:[#allocation32_spill] sm:$0xff] }
  0xb2   : > { %v729_v14 = vmul.f32 %v4301_v58, %v3149_v15  ;;  %v798_v45 = vadd.f32 %v3366_v43, %v4302_v57  ;;  %v800_v22 = vadd.f32 %v3366_v43, %v3204_v37  ;;  %v797_v35 = vadd.f32 %v3366_v43, %v4303_v9  ;;  %1905 = vperm.xlu1 %2661, %v1446_v46   ;;  %v3385_v40 = vpop.permute.xlu0 %786 }
  0xb3   : > { %v799_v17 = vadd.f32 %v3366_v43, %v3212_v61  ;;  %v802_v44 = vadd.f32 %v3366_v43, %v754_v56  ;;  %v753_v59 = vadd.f32 %v4304_v62, %v601_v3  ;;  %v451_v57 = vmul.f32 %v4305_v18, %v4296_v29  ;;  %2663 = vset.pattern.permute.xlu0 %v4306_v55 }
  0xb4   : > { %v761_v11 = vadd.f32 %v729_v14, %v609_v49  ;;  %v806_v37 = vadd.f32 %v3385_v40, %v3222_v52  ;;  %v830_v9 = vmax.f32 %v798_v45, 0.0  ;;  %v808_v61 = vadd.f32 %v3385_v40, %v3224_v63 }
  0xb5   : > { %v804_v46 = vadd.f32 %v3366_v43, %v756_v48  ;;  %v832_v1 = vmax.f32 %v800_v22, 0.0  ;;  %v805_v56 = vadd.f32 %v3385_v40, %v3232_v36  ;;  %v829_v3 = vmax.f32 %v797_v35, 0.0  ;;  %v3401_v29 = vpop.permute.xlu1 %867 }
  0xb6   : > { %v807_v49 = vadd.f32 %v3385_v40, %v3234_v20  ;;  %4307 = vst [vmem:[#allocation36_spill] sm:$0xff] %v3401_v29  ;;  %v838_v14 = vmax.f32 %v806_v37, 0.0  ;;  %v840_v62 = vmax.f32 %v808_v61, 0.0  ;;  %v831_v58 = vmax.f32 %v799_v17, 0.0  ;;  %1910 = vperm.xlu1 %2661, %v3251_v13   ;;  %v3405_v63 = vpop.permute.xlu0 %794 }
  0xb7   : > { %v810_v52 = vadd.f32 %v3385_v40, %v762_v7  ;;  %v837_v48 = vmax.f32 %v805_v56, 0.0  ;;  %v962_v36 = vmul.f32 %v2991_v25, %v3401_v29  ;;  %v964_v35 = vmul.f32 %v2997_v27, %v3401_v29 }
  0xb8   : > { %v839_v45 = vmax.f32 %v807_v49, 0.0  ;;  %v3411_v20 = vpack.c.bf16 %v838_v14, %v830_v9  ;;  %v3413_v22 = vpack.c.bf16 %v840_v62, %v832_v1  ;;  %v3416_v17 = vadd.f32 %v3405_v63, %v774_v23 }
  0xb9   : > { %v3419_v7 = vadd.f32 %v3405_v63, %v776_v6  ;;  %v3421_v13 = vpack.c.bf16 %v837_v48, %v829_v3  ;;  %v3426_v61 = vadd.f32 %v3405_v63, %v773_v47  ;;  %v3429_v56 = vadd.f32 %v3405_v63, %v775_v39  ;;  %v3431_v9 = vpop.permute.xlu1 %872 }
  0xba   : > { %4308 = vst [vmem:[#allocation9_spill] sm:$0xff] %v3411_v20  ;;  %4309 = vst [vmem:[#allocation14_spill] sm:$0xff] %v3413_v22  ;;  %v3423_v37 = vpack.c.bf16 %v839_v45, %v831_v58  ;;  %1518 = vmatprep.subr.bf16.mxu0 %v3411_v20  ;;  %1571 = vmatprep.subr.bf16.mxu1 %v3413_v22  ;;  %v3438_v6 = vadd.f32 %v3318_v42, %v962_v36  ;;  %v834_v58 = vmax.f32 %v802_v44, 0.0 }
  0xbb   : > { %4310 = vst [vmem:[#allocation31_spill] sm:$0xff] %v3421_v13  ;;  %4312 = vst [vmem:[#allocation42_spill] sm:$0xff] %v3431_v9  ;;  %1519 = vmatpush1.bf16.msra.mxu0 %v3421_v13  ;;  %v853_v47 = vmax.f32 %v3426_v61, 0.0  ;;  %v855_v39 = vmax.f32 %v3429_v56, 0.0  ;;  %v970_v3 = vmul.f32 %v2991_v25, %v3431_v9  ;;  %v3447_v49 = vadd.f32 %v3324_v16, %v964_v35 }
  0xbc   : > { %4311 = vst [vmem:[#allocation35_spill] sm:$0xff] %v3423_v37  ;;  %1572 = vmatpush1.bf16.msra.mxu1 %v3423_v37  ;;  %v972_v14 = vmul.f32 %v2997_v27, %v3431_v9  ;;  %v961_v42 = vmul.f32 %v3007_v32, %v3401_v29  ;;  %v969_v44 = vmul.f32 %v3007_v32, %v3431_v9  ;;  %v842_v16 = vmax.f32 %v810_v52, 0.0 }
  0xbd   : > { %v963_v62 = vmul.f32 %v3013_v34, %v3401_v29  ;;  %2662 = vset.pattern.permute.xlu1 %v4306_v55  ;;  %v3460_v48 = vmul.f32 %v3013_v34, %v3431_v9  ;;  %v812_v45 = vadd.f32 %v3385_v40, %v3344_v41  ;;  %v801_v36 = vadd.f32 %v3366_v43, %v753_v59  ;;  %v4315_v41 = vld [vmem:[#allocation33_spill] sm:$0xff]  ;;  %v4325_v9 = vld [vmem:[#allocation38_spill] sm:$0xff] }
  0xbe   : > { %v3466_v35 = vadd.f32 %v3328_v2, %v961_v42  ;;  %v836_v61 = vmax.f32 %v804_v46, 0.0  ;;  %v809_v56 = vadd.f32 %v3385_v40, %v761_v11  ;;  %v459_v23 = vmul.f32 %v4305_v18, %v3184_v5  ;;  %v3471_v55 = vpop.permute.xlu1 %998 }
  0xbf   : > { %4313 = vst [vmem:[#allocation43_spill] sm:$0xff] %v3471_v55  ;;  %v3474_v1 = vadd.f32 %v3352_v50, %v963_v62  ;;  %v3476_v52 = vpack.c.bf16 %v842_v16, %v834_v58  ;;  %v844_v37 = vmax.f32 %v812_v45, 0.0  ;;  %v603_v22 = vadd.f32 %v4315_v41, %v451_v57  ;;  %v4317_v50 = vld [vmem:[#allocation37_spill] sm:$0xff]  ;;  %v4318_v58 = vld [vmem:[#allocation18_spill] sm:$0xff] }
  0xc0   : > { %v1090_v2 = vmul.f32 %v2994_v26, %v3471_v55  ;;  %v1092_v59 = vmul.f32 %v3000_v28, %v3471_v55  ;;  %v1089_v11 = vmul.f32 %v3010_v33, %v3471_v55  ;;  %v833_v5 = vmax.f32 %v801_v36, 0.0 }
  0xc1   : > { %4314 = vst [vmem:[#allocation32_spill] sm:$0xff] %v3476_v52  ;;  %v3485_v46 = vpack.c.bf16 %v844_v37, %v836_v61  ;;  %v841_v42 = vmax.f32 %v809_v56, 0.0  ;;  %v611_v62 = vadd.f32 %v4317_v50, %v459_v23  ;;  %v731_v16 = vmul.f32 %v4318_v58, %v3149_v15  ;;  %v4320_v52 = vld [vmem:[#allocation34_spill] sm:$0xff]  ;;  %v4321_v56 = vld [vmem:[#allocation44_spill] sm:$0xff] }
  0xc2   : > { %v1122_v45 = vadd.f32 %v1090_v2, %v970_v3  ;;  %v3490_v57 = vadd.f32 %v1092_v59, %v972_v14  ;;  %v3492_v41 = vadd.f32 %v1089_v11, %v969_v44  ;;  %v1091_v13 = vmul.f32 %v4298_v38, %v3471_v55  ;;  %v4322_v3 = vld [vmem:[#allocation45_spill] sm:$0xff]  ;;  %v4323_v14 = vld [vmem:[#allocation4_spill] sm:$0xff]  ;;  %v4324_v59 = vld [vmem:[#allocation6_spill] sm:$0xff] }
  0xc3   : > { %4316 = vst [vmem:[#allocation11_spill] sm:$0xff] %v3485_v46  ;;  %v3496_v20 = vpack.c.bf16 %v841_v42, %v833_v5  ;;  %v755_v36 = vadd.f32 %v4320_v52, %v603_v22  ;;  %v763_v37 = vadd.f32 %v731_v16, %v611_v62  ;;  %v466_v61 = vmul.f32 %v2938_v53, %v3192_v21  ;;  %v3501_v23 = vpop.permute.xlu1 %790 }
  0xc4   : > { %v474_v15 = vmul.f32 %v2938_v53, %v4321_v56  ;;  %v586_v44 = vmul.f32 %v4323_v14, %v4322_v3  ;;  %v594_v2 = vmul.f32 %v4323_v14, %v3268_v4  ;;  %v746_v11 = vmul.f32 %v4324_v59, %v3320_v8 }
  0xc5   : > { %4319 = vst [vmem:[#allocation33_spill] sm:$0xff] %v3496_v20  ;;  %v814_v22 = vadd.f32 %v3501_v23, %v3287_v51  ;;  %v816_v52 = vadd.f32 %v3501_v23, %v3296_v10  ;;  %v813_v5 = vadd.f32 %v3501_v23, %v3301_v24  ;;  %v815_v53 = vadd.f32 %v3501_v23, %v3308_v54 }
  0xc6   : > { %v803_v42 = vadd.f32 %v3366_v43, %v755_v36  ;;  %v811_v50 = vadd.f32 %v3385_v40, %v763_v37  ;;  %v618_v62 = vadd.f32 %v586_v44, %v466_v61  ;;  %v626_v16 = vadd.f32 %v594_v2, %v474_v15  ;;  %v4328_v61 = vld [vmem:[#allocation15_spill] sm:$0xff]  ;;  %v4330_v2 = vld [vmem:[#allocation17_spill] sm:$0xff] }
  0xc7   : > { %v846_v14 = vmax.f32 %v814_v22, 0.0  ;;  %v848_v59 = vmax.f32 %v816_v52, 0.0  ;;  %v845_v20 = vmax.f32 %v813_v5, 0.0  ;;  %v847_v46 = vmax.f32 %v815_v53, 0.0 }
  0xc8   : > { %v835_v51 = vmax.f32 %v803_v42, 0.0  ;;  %v843_v55 = vmax.f32 %v811_v50, 0.0  ;;  %v770_v10 = vadd.f32 %v4325_v9, %v618_v62  ;;  %v778_v29 = vadd.f32 %v746_v11, %v626_v16  ;;  %v3522_v58 = vpop.permute.xlu1 %1146  ;;  %v4329_v9 = vld [vmem:[#allocation16_spill] sm:$0xff] }
  0xc9   : > { %v4326_v24 = vmax.f32 %v3416_v17, 0.0  ;;  %v4327_v43 = vmax.f32 %v3419_v7, 0.0  ;;  %v3532_v36 = vpack.c.bf16 %v853_v47, %v845_v20  ;;  %v3534_v37 = vpack.c.bf16 %v855_v39, %v847_v46  ;;  %v4331_v17 = vld [vmem:[#allocation19_spill] sm:$0xff]  ;;  %v3546_v20 = vpop.permute.xlu0 %1298 }
  0xca   : > { %v1234_v15 = vmul.f32 %v4328_v61, %v3522_v58  ;;  %v1236_v44 = vmul.f32 %v4329_v9, %v3522_v58  ;;  %v1233_v11 = vmul.f32 %v4330_v2, %v3522_v58  ;;  %v1235_v22 = vmul.f32 %v4331_v17, %v3522_v58 }
  0xcb   : > { %v3526_v54 = vpack.c.bf16 %v4326_v24, %v846_v14  ;;  %v3530_v40 = vpack.c.bf16 %v4327_v43, %v848_v59  ;;  %v3548_v7 = vpack.c.bf16 %v843_v55, %v835_v51  ;;  %v818_v47 = vadd.f32 %v3501_v23, %v770_v10 }
  0xcc   : > { %v826_v39 = vadd.f32 %v3405_v63, %v778_v29  ;;  %v1266_v46 = vadd.f32 %v1234_v15, %v3438_v6  ;;  %v1268_v52 = vadd.f32 %v1236_v44, %v3447_v49  ;;  %v1265_v5 = vadd.f32 %v1233_v11, %v3466_v35  ;;  %v3557_v53 = vpop.permute.xlu1 %1150  ;;  %v4341_v15 = vld [vmem:[#allocation40_spill] sm:$0xff] }
  0xcd   : > { %1520 = vmatprep.subr.bf16.mxu0 %v3526_v54  ;;  %1573 = vmatprep.subr.bf16.mxu1 %v3530_v40  ;;  %v1123_v42 = vadd.f32 %v1091_v13, %v3460_v48  ;;  %v1267_v55 = vadd.f32 %v1235_v22, %v3474_v1  ;;  %v850_v50 = vmax.f32 %v818_v47, 0.0  ;;  %v1242_v29 = vmul.f32 %v4328_v61, %v3557_v53  ;;  %v4332_v22 = vld [vmem:[#allocation5_spill] sm:$0xff] }
  0xce   : > { %1521 = vmatpush1.bf16.msra.mxu0 %v3532_v36  ;;  %1574 = vmatpush1.bf16.msra.mxu1 %v3534_v37  ;;  %v858_v62 = vmax.f32 %v826_v39, 0.0  ;;  %v3564_v16 = vadd.f32 %v3546_v20, %v1266_v46  ;;  %v1244_v6 = vmul.f32 %v4329_v9, %v3557_v53  ;;  %v3569_v49 = vadd.f32 %v3546_v20, %v1268_v52 }
  0xcf   : > { %v1241_v35 = vmul.f32 %v4330_v2, %v3557_v53  ;;  %v3574_v13 = vadd.f32 %v3546_v20, %v1265_v5  ;;  %v1243_v1 = vmul.f32 %v4331_v17, %v3557_v53  ;;  %v468_v48 = vmul.f32 %v2970_v12, %v3192_v21 }
  0xd0   : > { %v3580_v14 = vadd.f32 %v1242_v29, %v1122_v45  ;;  %v1346_v59 = vmax.f32 %v3564_v16, 0.0  ;;  %v3584_v51 = vadd.f32 %v1244_v6, %v3490_v57  ;;  %v3587_v10 = vadd.f32 %v3546_v20, %v1267_v55 }
  0xd1   : > { %v3591_v43 = vadd.f32 %v1241_v35, %v3492_v41  ;;  %v3594_v44 = vadd.f32 %v1243_v1, %v1123_v42  ;;  %v3596_v11 = vpop.permute.xlu1 %882  ;;  %v3598_v45 = vpack.c.bf16 %v858_v62, %v850_v50  ;;  %v476_v57 = vmul.f32 %v2970_v12, %v4321_v56  ;;  %v4333_v50 = vld [vmem:[#allocation7_spill] sm:$0xff] }
  0xd2   : > { %v588_v47 = vmul.f32 %v4332_v22, %v4322_v3  ;;  %v596_v39 = vmul.f32 %v4332_v22, %v3268_v4  ;;  %v986_v41 = vmul.f32 %v2991_v25, %v3596_v11  ;;  %v988_v46 = vmul.f32 %v2997_v27, %v3596_v11  ;;  %v4334_v35 = vld [vmem:[#allocation39_spill] sm:$0xff] }
  0xd3   : > { %v985_v52 = vmul.f32 %v3007_v32, %v3596_v11  ;;  %v987_v5 = vmul.f32 %v3013_v34, %v3596_v11  ;;  %v748_v62 = vmul.f32 %v4333_v50, %v3320_v8  ;;  %v465_v27 = vmul.f32 %v4297_v19, %v3192_v21  ;;  %v4337_v50 = vld [vmem:[#allocation47_spill] sm:$0xff] }
  0xd4   : > { %v620_v42 = vadd.f32 %v588_v47, %v468_v48  ;;  %v628_v55 = vadd.f32 %v596_v39, %v476_v57  ;;  %v1138_v29 = vadd.f32 %v3356_v60, %v986_v41  ;;  %v1140_v25 = vadd.f32 %v3360_v31, %v988_v46  ;;  %v4335_v48 = vld [vmem:[#allocation8_spill] sm:$0xff] }
  0xd5   : > { %v1137_v6 = vadd.f32 %v3364_v30, %v985_v52  ;;  %v1139_v32 = vadd.f32 %v3370_v0, %v987_v5  ;;  %v473_v1 = vmul.f32 %v4297_v19, %v4321_v56  ;;  %v585_v57 = vmul.f32 %v4335_v48, %v4322_v3  ;;  %v4336_v30 = vld [vmem:[#allocation10_spill] sm:$0xff] }
  0xd6   : > { %v772_v34 = vadd.f32 %v4334_v35, %v620_v42  ;;  %v3628_v22 = vpop.permute.xlu1 %1002  ;;  %v780_v60 = vadd.f32 %v748_v62, %v628_v55  ;;  %v593_v31 = vmul.f32 %v4335_v48, %v3268_v4  ;;  %v745_v47 = vmul.f32 %v4336_v30, %v3320_v8  ;;  %v4338_v62 = vld [vmem:[#allocation48_spill] sm:$0xff]  ;;  %v4340_v30 = vld [vmem:[#allocation50_spill] sm:$0xff] }
  0xd7   : > { %v467_v0 = vmul.f32 %v4305_v18, %v3192_v21  ;;  %v1098_v39 = vmul.f32 %v2994_v26, %v3628_v22  ;;  %v1100_v19 = vmul.f32 %v3000_v28, %v3628_v22  ;;  %v1097_v41 = vmul.f32 %v3010_v33, %v3628_v22  ;;  %v4339_v26 = vld [vmem:[#allocation49_spill] sm:$0xff] }
  0xd8   : > { %v1099_v46 = vmul.f32 %v4298_v38, %v3628_v22  ;;  %v820_v52 = vadd.f32 %v3501_v23, %v772_v34  ;;  %v828_v5 = vadd.f32 %v3405_v63, %v780_v60  ;;  %v617_v42 = vadd.f32 %v585_v57, %v465_v27  ;;  %v4342_v27 = vld [vmem:[#allocation12_spill] sm:$0xff] }
  0xd9   : > { %v625_v55 = vadd.f32 %v593_v31, %v473_v1  ;;  %v1130_v21 = vadd.f32 %v1098_v39, %v4337_v50  ;;  %v1132_v35 = vadd.f32 %v1100_v19, %v4338_v62  ;;  %v1129_v48 = vadd.f32 %v1097_v41, %v4339_v26  ;;  %v4343_v31 = vld [vmem:[#allocation18_spill] sm:$0xff] }
  0xda   : > { %v475_v28 = vmul.f32 %v4305_v18, %v4321_v56  ;;  %v1131_v33 = vadd.f32 %v1099_v46, %v4340_v30  ;;  %v852_v12 = vmax.f32 %v820_v52, 0.0  ;;  %v769_v38 = vadd.f32 %v4341_v15, %v617_v42  ;;  %v4345_v42 = vld [vmem:[#allocation20_spill] sm:$0xff] }
  0xdb   : > { %v777_v24 = vadd.f32 %v745_v47, %v625_v55  ;;  %v3653_v34 = vpop.permute.xlu1 %1154  ;;  %v860_v60 = vmax.f32 %v828_v5, 0.0  ;;  %v587_v1 = vmul.f32 %v4342_v27, %v4322_v3  ;;  %v595_v57 = vmul.f32 %v4342_v27, %v3268_v4  ;;  %v4344_v5 = vld [vmem:[#allocation36_spill] sm:$0xff]  ;;  %v4346_v27 = vld [vmem:[#allocation41_spill] sm:$0xff] }
  0xdc   : > { %v747_v39 = vmul.f32 %v4343_v31, %v3320_v8  ;;  %v1250_v18 = vmul.f32 %v4328_v61, %v3653_v34  ;;  %v1252_v56 = vmul.f32 %v4329_v9, %v3653_v34  ;;  %v1249_v15 = vmul.f32 %v4330_v2, %v3653_v34 }
  0xdd   : > { %v1251_v47 = vmul.f32 %v4331_v17, %v3653_v34  ;;  %v3669_v19 = vpack.c.bf16 %v860_v60, %v852_v12  ;;  %v817_v3 = vadd.f32 %v3501_v23, %v769_v38  ;;  %v825_v4 = vadd.f32 %v3405_v63, %v777_v24 }
  0xde   : > { %v619_v41 = vadd.f32 %v587_v1, %v467_v0  ;;  %v1282_v8 = vadd.f32 %v1250_v18, %v1130_v21  ;;  %v1284_v46 = vadd.f32 %v1252_v56, %v1132_v35  ;;  %v1281_v52 = vadd.f32 %v1249_v15, %v1129_v48  ;;  %v4347_v15 = vld [vmem:[#allocation42_spill] sm:$0xff] }
  0xdf   : > { %v966_v55 = vmul.f32 %v4345_v42, %v4344_v5  ;;  %v3675_v50 = vpop.permute.xlu1 %1158  ;;  %v849_v62 = vmax.f32 %v817_v3, 0.0  ;;  %v857_v26 = vmax.f32 %v825_v4, 0.0  ;;  %v627_v30 = vadd.f32 %v595_v57, %v475_v28  ;;  %v4348_v3 = vld [vmem:[#allocation51_spill] sm:$0xff] }
  0xe0   : > { %v771_v31 = vadd.f32 %v4346_v27, %v619_v41  ;;  %v1258_v12 = vmul.f32 %v4328_v61, %v3675_v50  ;;  %v1260_v24 = vmul.f32 %v4329_v9, %v3675_v50  ;;  %v1257_v0 = vmul.f32 %v4330_v2, %v3675_v50  ;;  %v3689_v61 = vpop.permute.xlu0 %1310 }
  0xe1   : > { %v1259_v21 = vmul.f32 %v4331_v17, %v3675_v50  ;;  %v1283_v35 = vadd.f32 %v1251_v47, %v1131_v33  ;;  %v3686_v48 = vpack.c.bf16 %v857_v26, %v849_v62  ;;  %v779_v38 = vadd.f32 %v747_v39, %v627_v30  ;;  %v4349_v17 = vld [vmem:[#allocation21_spill] sm:$0xff] }
  0xe2   : > { %v819_v28 = vadd.f32 %v3501_v23, %v771_v31  ;;  %v1290_v60 = vadd.f32 %v1258_v12, %v1138_v29  ;;  %v1292_v1 = vadd.f32 %v1260_v24, %v1140_v25  ;;  %v1289_v57 = vadd.f32 %v1257_v0, %v1137_v6  ;;  %v4350_v25 = vld [vmem:[#allocation43_spill] sm:$0xff] }
  0xe3   : > { %v1291_v18 = vadd.f32 %v1259_v21, %v1139_v32  ;;  %v827_v9 = vadd.f32 %v3405_v63, %v779_v38  ;;  %v974_v2 = vmul.f32 %v4345_v42, %v4347_v15  ;;  %v1086_v33 = vmul.f32 %v4349_v17, %v4348_v3 }
  0xe4   : > { %v851_v56 = vmax.f32 %v819_v28, 0.0  ;;  %v3696_v47 = vpop.permute.xlu1 %1302  ;;  %v1338_v39 = vadd.f32 %v3689_v61, %v1290_v60  ;;  %v1340_v23 = vadd.f32 %v3689_v61, %v1292_v1  ;;  %v1337_v29 = vadd.f32 %v3689_v61, %v1289_v57  ;;  %v4351_v28 = vld [vmem:[#allocation27_spill] sm:$0xff] }
  0xe5   : > { %v1094_v6 = vmul.f32 %v4349_v17, %v4350_v25  ;;  %v1322_v63 = vadd.f32 %v3696_v47, %v3580_v14  ;;  %v1324_v32 = vadd.f32 %v3696_v47, %v3584_v51  ;;  %v1321_v4 = vadd.f32 %v3696_v47, %v3591_v43 }
  0xe6   : > { %v1323_v41 = vadd.f32 %v3696_v47, %v3594_v44  ;;  %v1370_v62 = vmax.f32 %v1338_v39, 0.0  ;;  %v1372_v26 = vmax.f32 %v1340_v23, 0.0  ;;  %v1369_v30 = vmax.f32 %v1337_v29, 0.0 }
  0xe7   : > { %v1339_v27 = vadd.f32 %v3689_v61, %v1291_v18  ;;  %v1354_v31 = vmax.f32 %v1322_v63, 0.0  ;;  %v1356_v12 = vmax.f32 %v1324_v32, 0.0  ;;  %v1353_v24 = vmax.f32 %v1321_v4, 0.0  ;;  %v4357_v32 = vld [vmem:[#allocation13_spill] sm:$0xff] }
  0xe8   : > { %v1355_v0 = vmax.f32 %v1323_v41, 0.0  ;;  %v3712_v21 = vpop.permute.xlu1 %1306  ;;  %v859_v14 = vmax.f32 %v827_v9, 0.0  ;;  %v1118_v38 = vadd.f32 %v1086_v33, %v966_v55  ;;  %v1126_v51 = vadd.f32 %v1094_v6, %v974_v2  ;;  %v4355_v6 = vld [vmem:[#allocation22_spill] sm:$0xff] }
  0xe9   : > { %v1238_v43 = vmul.f32 %v4351_v28, %v3522_v58  ;;  %v3718_v44 = vpack.c.bf16 %v1354_v31, %v1346_v59  ;;  %v4352_v60 = vmax.f32 %v3569_v49, 0.0  ;;  %v4353_v57 = vmax.f32 %v3574_v13, 0.0 }
  0xea   : > { %v4354_v39 = vmax.f32 %v3587_v10, 0.0  ;;  %v1330_v55 = vadd.f32 %v3712_v21, %v1282_v8  ;;  %v1332_v2 = vadd.f32 %v3712_v21, %v1284_v46  ;;  %v1329_v16 = vadd.f32 %v3712_v21, %v1281_v52 }
  0xeb   : > { %v3722_v1 = vpack.c.bf16 %v1356_v12, %v4352_v60  ;;  %v3726_v18 = vpack.c.bf16 %v1353_v24, %v4353_v57  ;;  %v1331_v59 = vadd.f32 %v3712_v21, %v1283_v35  ;;  %1522 = vmatprep.subr.bf16.mxu0 %v3718_v44  ;;  %v1371_v49 = vmax.f32 %v1339_v27, 0.0 }
  0xec   : > { %v3730_v9 = vpack.c.bf16 %v1355_v0, %v4354_v39  ;;  %v3738_v13 = vpack.c.bf16 %v859_v14, %v851_v56  ;;  %v1246_v10 = vmul.f32 %v4351_v28, %v3557_v53  ;;  %v1270_v33 = vadd.f32 %v1238_v43, %v1118_v38  ;;  %v4356_v56 = vld [vmem:[#allocation3_spill] sm:$0xff]  ;;  %v4361_v39 = vld [vmem:[#allocation24_spill] sm:$0xff] }
  0xed   : > { %1575 = vmatprep.subr.bf16.mxu1 %v3722_v1  ;;  %1523 = vmatpush1.bf16.msra.mxu0 %v3726_v18  ;;  %v1362_v8 = vmax.f32 %v1330_v55, 0.0  ;;  %v1364_v46 = vmax.f32 %v1332_v2, 0.0  ;;  %v1361_v52 = vmax.f32 %v1329_v16, 0.0  ;;  %v1363_v23 = vmax.f32 %v1331_v59, 0.0  ;;  %v4359_v38 = vld [vmem:[#allocation23_spill] sm:$0xff] }
  0xee   : > { %1576 = vmatpush1.bf16.msra.mxu1 %v3730_v9  ;;  %v1278_v35 = vadd.f32 %v1246_v10, %v1126_v51  ;;  %v1318_v29 = vadd.f32 %v3546_v20, %v1270_v33  ;;  %v968_v63 = vmul.f32 %v4355_v6, %v4344_v5  ;;  %v4358_v4 = vrot.slane %v4357_v32, %v4356_v56  ;;  %v4362_v10 = vld [vmem:[#allocation32_spill] sm:$0xff]  ;;  %v4363_v33 = vld [vmem:[#allocation11_spill] sm:$0xff] }
  0xef   : > { %v3753_v27 = vpack.c.bf16 %v1370_v62, %v1362_v8  ;;  %v3755_v31 = vpack.c.bf16 %v1372_v26, %v1364_v46  ;;  %v3757_v12 = vpack.c.bf16 %v1369_v30, %v1361_v52  ;;  %v3759_v24 = vpack.c.bf16 %v1371_v49, %v1363_v23  ;;  %v3773_v62 = vld [vmem:[%s4176_s3] sm:$0xff]   ;;  %v4360_v30 = vld [vmem:[#allocation28_spill] sm:$0xff]  ;;  %v4364_v8 = vld [vmem:[#allocation25_spill] sm:$0xff] }
  0xf0   : > { %v3751_v41 = vrot.slane %v4358_v4, %v4356_v56  ;;  %v1326_v0 = vadd.f32 %v3696_v47, %v1278_v35  ;;  %v976_v14 = vmul.f32 %v4355_v6, %v4347_v15  ;;  %v1088_v51 = vmul.f32 %v4359_v38, %v4348_v3  ;;  %v4365_v23 = vld [vmem:[#allocation29_spill] sm:$0xff] }
  0xf1   : > { %v1096_v43 = vmul.f32 %v4359_v38, %v4350_v25  ;;  %1524 = vmatprep.subr.bf16.mxu0 %v3753_v27  ;;  %1577 = vmatprep.subr.bf16.mxu1 %v3755_v31  ;;  %v1350_v26 = vmax.f32 %v1318_v29, 0.0  ;;  %v1240_v60 = vmul.f32 %v4360_v30, %v3522_v58  ;;  %v1248_v57 = vmul.f32 %v4360_v30, %v3557_v53 }
  0xf2   : > { %v965_v55 = vmul.f32 %v4361_v39, %v4344_v5  ;;  %1525 = vmatpush1.bf16.msra.mxu0 %v3757_v12  ;;  %1578 = vmatpush1.bf16.msra.mxu1 %v3759_v24  ;;  %v1358_v2 = vmax.f32 %v1326_v0, 0.0  ;;  %v1120_v16 = vadd.f32 %v1088_v51, %v968_v63  ;;  %v973_v49 = vmul.f32 %v4361_v39, %v4347_v15 }
  0xf3   : > { %v1128_v59 = vadd.f32 %v1096_v43, %v976_v14  ;;  %1624 = vmatprep.subr.bf16.mxu0 %v4362_v10  ;;  %1677 = vmatprep.subr.bf16.mxu1 %v4363_v33  ;;  %v1085_v46 = vmul.f32 %v4364_v8, %v4348_v3  ;;  %v1093_v52 = vmul.f32 %v4364_v8, %v4350_v25  ;;  %v4366_v14 = vld [vmem:[#allocation26_spill] sm:$0xff]  ;;  %v4367_v43 = vld [vmem:[#allocation33_spill] sm:$0xff] }
  0xf4   : > { %v1237_v35 = vmul.f32 %v4365_v23, %v3522_v58  ;;  %v3793_v29 = vpack.c.bf16 %v1358_v2, %v1350_v26  ;;  %v1272_v63 = vadd.f32 %v1240_v60, %v1120_v16  ;;  %v1245_v32 = vmul.f32 %v4365_v23, %v3557_v53  ;;  %v4368_v16 = vld [vmem:[#allocation30_spill] sm:$0xff] }
  0xf5   : > { %v1280_v56 = vadd.f32 %v1248_v57, %v1128_v59  ;;  %2576 = vmatmul.mubr.msk.bf16.vlgmr.msra.gmra.mrb[0].mxu0 %vm1511_vm0, %v3773_v62  ;;  %2578 = vmatmul.mubr.msk.bf16.vlgmr.msra.gmra.mrb[0].mxu1 %vm1511_vm0, %v3773_v62  ;;  %v1117_v4 = vadd.f32 %v1085_v46, %v965_v55  ;;  %v1125_v0 = vadd.f32 %v1093_v52, %v973_v49  ;;  %v4369_v46 = vmov 0  }
  0xf6   : > { %v967_v51 = vmul.f32 %v4366_v14, %v4344_v5  ;;  %1625 = vmatpush1.bf16.msra.mxu0 %v4367_v43  ;;  %1678 = vmatpush1.bf16.msra.mxu1 %v3548_v7  ;;  %v1320_v26 = vadd.f32 %v3546_v20, %v1272_v63  ;;  %v975_v57 = vmul.f32 %v4366_v14, %v4347_v15 }
  0xf7   : > { %v1328_v60 = vadd.f32 %v3696_v47, %v1280_v56  ;;  %1626 = vmatprep.subr.bf16.mxu0 %v3598_v45  ;;  %1679 = vmatprep.subr.bf16.mxu1 %v3669_v19  ;;  %v1269_v55 = vadd.f32 %v1237_v35, %v1117_v4  ;;  %v1277_v2 = vadd.f32 %v1245_v32, %v1125_v0  ;;  %v3822_v35 = vld [vmem:[%s4176_s3 + $0x8] sm:$0xff]   ;;  %v4370_v4 = vld [vmem:[#allocation46_spill] sm:$0xff] }
  0xf8   : > { %v1087_v5 = vmul.f32 %v4368_v16, %v4348_v3  ;;  %v1352_v59 = vmax.f32 %v1320_v26, 0.0  ;;  %1560 = vmatprep.mubr.bf16.mxu0 %v4369_v46  ;;  %1613 = vmatprep.mubr.bf16.mxu1 %v4369_v46  ;;  %v1095_v52 = vmul.f32 %v4368_v16, %v4350_v25  ;;  %v1239_v15 = vmul.f32 %v3751_v41, %v3522_v58 }
  0xf9   : > { %v1360_v49 = vmax.f32 %v1328_v60, 0.0  ;;  %v1317_v63 = vadd.f32 %v3546_v20, %v1269_v55  ;;  %v1325_v3 = vadd.f32 %v3696_v47, %v1277_v2  ;;  %v1247_v32 = vmul.f32 %v3751_v41, %v3557_v53 }
  0xfa   : > { %v1119_v56 = vadd.f32 %v1087_v5, %v967_v51  ;;  %1627 = vmatpush1.bf16.msra.mxu0 %v3686_v48  ;;  %1680 = vmatpush1.bf16.msra.mxu1 %v3738_v13  ;;  %v1127_v58 = vadd.f32 %v1095_v52, %v975_v57  ;;  %v982_v0 = vmul.f32 %v4345_v42, %v4370_v4  ;;  %v4371_v5 = vld [vmem:[#allocation52_spill] sm:$0xff] }
  0xfb   : > { %v3830_v25 = vpack.c.bf16 %v1360_v49, %v1352_v59  ;;  %1628 = vmatprep.subr.bf16.mxu0 %v3793_v29  ;;  %v1349_v26 = vmax.f32 %v1317_v63, 0.0  ;;  %v1357_v60 = vmax.f32 %v1325_v3, 0.0  ;;  %v990_v51 = vmul.f32 %v4345_v42, %v3596_v11 }
  0xfc   : > { %v1271_v55 = vadd.f32 %v1239_v15, %v1119_v56  ;;  %v1279_v53 = vadd.f32 %v1247_v32, %v1127_v58  ;;  %v1102_v2 = vmul.f32 %v4349_v17, %v3628_v22  ;;  %v1110_v57 = vmul.f32 %v4349_v17, %v4371_v5 }
  0xfd   : > { %1681 = vmatprep.subr.bf16.mxu1 %v3830_v25  ;;  %v1254_v59 = vmul.f32 %v4351_v28, %v3653_v34  ;;  %2577 = vmatmul.mubr.msk.bf16.gmra.mrb[4].mxu0 %vm1511_vm0, %v3822_v35  ;;  %v3848_v49 = vpack.c.bf16 %v1357_v60, %v1349_v26  ;;  %v1262_v52 = vmul.f32 %v4351_v28, %v3675_v50 }
  0xfe   : > { %2579 = vmatmul.mubr.msk.bf16.gmra.mrb[4].mxu1 %vm1511_vm0, %v3822_v35  ;;  %v1319_v42 = vadd.f32 %v3546_v20, %v1271_v55  ;;  %v1327_v15 = vadd.f32 %v3696_v47, %v1279_v53  ;;  %v1134_v63 = vadd.f32 %v1102_v2, %v982_v0  ;;  %v1142_v17 = vadd.f32 %v1110_v57, %v990_v51 }
  0xff   : > { %v984_v3 = vmul.f32 %v4355_v6, %v4370_v4  ;;  %1656 = vmatprep.mubr.bf16.mxu0 %v4369_v46  ;;  %1629 = vmatpush1.bf16.msra.mxu0 %v3848_v49  ;;  %v992_v32 = vmul.f32 %v4355_v6, %v3596_v11  ;;  %v1104_v20 = vmul.f32 %v4359_v38, %v3628_v22 }
 0x100   : > { %v1351_v56 = vmax.f32 %v1319_v42, 0.0  ;;  %v1112_v28 = vmul.f32 %v4359_v38, %v4371_v5  ;;  %1709 = vmatprep.mubr.bf16.mxu1 %v4369_v46  ;;  %v1359_v47 = vmax.f32 %v1327_v15, 0.0  ;;  %v1286_v58 = vadd.f32 %v1254_v59, %v1134_v63 }
 0x101   : > { %v1294_v0 = vadd.f32 %v1262_v52, %v1142_v17  ;;  %v1256_v26 = vmul.f32 %v4360_v30, %v3653_v34  ;;  %v1136_v60 = vadd.f32 %v1104_v20, %v984_v3  ;;  %v1264_v51 = vmul.f32 %v4360_v30, %v3675_v50 }
 0x102   : > { %v1144_v55 = vadd.f32 %v1112_v28, %v992_v32  ;;  %v981_v6 = vmul.f32 %v4361_v39, %v4370_v4  ;;  %v3871_v53 = vpack.c.bf16 %v1359_v47, %v1351_v56  ;;  %v1334_v38 = vadd.f32 %v3712_v21, %v1286_v58 }
 0x103   : > { %v1342_v2 = vadd.f32 %v3689_v61, %v1294_v0  ;;  %v989_v57 = vmul.f32 %v4361_v39, %v3596_v11  ;;  %v1288_v59 = vadd.f32 %v1256_v26, %v1136_v60  ;;  %v1101_v52 = vmul.f32 %v4364_v8, %v3628_v22 }
 0x104   : > { %v1296_v42 = vadd.f32 %v1264_v51, %v1144_v55  ;;  %v1109_v30 = vmul.f32 %v4364_v8, %v4371_v5  ;;  %1682 = vmatpush1.bf16.msra.mxu1 %v3871_v53  ;;  %v1366_v15 = vmax.f32 %v1334_v38, 0.0  ;;  %v1253_v17 = vmul.f32 %v4365_v23, %v3653_v34 }
 0x105   : > { %v1374_v63 = vmax.f32 %v1342_v2, 0.0  ;;  %v1261_v3 = vmul.f32 %v4365_v23, %v3675_v50  ;;  %v1336_v39 = vadd.f32 %v3712_v21, %v1288_v59  ;;  %v1133_v32 = vadd.f32 %v1101_v52, %v981_v6  ;;  %v4372_v52 = vld [vmem:[#allocation9_spill] sm:$0xff] }
 0x106   : > { %v1344_v56 = vadd.f32 %v3689_v61, %v1296_v42  ;;  %v1141_v20 = vadd.f32 %v1109_v30, %v989_v57  ;;  %v983_v8 = vmul.f32 %v4366_v14, %v4370_v4  ;;  %v991_v47 = vmul.f32 %v4366_v14, %v3596_v11 }
 0x107   : > { %v3888_v28 = vpack.c.bf16 %v1374_v63, %v1366_v15  ;;  %v1103_v58 = vmul.f32 %v4368_v16, %v3628_v22  ;;  %v1368_v0 = vmax.f32 %v1336_v39, 0.0  ;;  %v1285_v23 = vadd.f32 %v1253_v17, %v1133_v32  ;;  %v4373_v15 = vld [vmem:[#allocation31_spill] sm:$0xff] }
 0x108   : > { %v1376_v26 = vmax.f32 %v1344_v56, 0.0  ;;  %v1293_v60 = vadd.f32 %v1261_v3, %v1141_v20  ;;  %v1111_v55 = vmul.f32 %v4368_v16, %v4371_v5  ;;  %v1255_v6 = vmul.f32 %v3751_v41, %v3653_v34 }
 0x109   : > { %1630 = vmatprep.subr.bf16.mxu0 %v3888_v28  ;;  %v1135_v51 = vadd.f32 %v1103_v58, %v983_v8  ;;  %v1263_v4 = vmul.f32 %v3751_v41, %v3675_v50  ;;  %v1333_v22 = vadd.f32 %v3712_v21, %v1285_v23 }
 0x10a   : > { %v3903_v11 = vpack.c.bf16 %v1376_v26, %v1368_v0  ;;  %v1341_v14 = vadd.f32 %v3689_v61, %v1293_v60  ;;  %v1143_v38 = vadd.f32 %v1111_v55, %v991_v47 }
 0x10b   : > { %v1287_v2 = vadd.f32 %v1255_v6, %v1135_v51  ;;  %v1365_v57 = vmax.f32 %v1333_v22, 0.0 }
 0x10c   : > { %1683 = vmatprep.subr.bf16.mxu1 %v3903_v11  ;;  %v1373_v59 = vmax.f32 %v1341_v14, 0.0  ;;  %v1295_v16 = vadd.f32 %v1263_v4, %v1143_v38 }
 0x10d   : > { %v1335_v5 = vadd.f32 %v3712_v21, %v1287_v2  ;;  %v4375_v21 = vld [vmem:[#allocation35_spill] sm:$0xff] }
 0x10e   : > { %v3909_v42 = vpack.c.bf16 %v1373_v59, %v1365_v57  ;;  %v1343_v34 = vadd.f32 %v3689_v61, %v1295_v16  ;;  %v4374_v61 = vld [vmem:[#allocation14_spill] sm:$0xff] }
 0x10f   : > { %v1367_v50 = vmax.f32 %v1335_v5, 0.0 }
 0x110   : > { %1631 = vmatpush1.bf16.msra.mxu0 %v3909_v42  ;;  %v1375_v41 = vmax.f32 %v1343_v34, 0.0 }
 0x111   : > { %1935 = vmatprep.subr.bf16.mxu0 %v4372_v52  ;;  %v1731_v52 = vld [vmem:[%s3976_s15 + $0x8] sm:$0xff] }
 0x112   : > { %v3914_v30 = vpack.c.bf16 %v1375_v41, %v1367_v50  ;;  %v1730_v41 = vld [vmem:[%s3976_s15] sm:$0xff] }
 0x113   : > { %2580 = vmatmul.mubr.msk.bf16.vlgmr.msra.gmra.mrb[8].mxu0 %vm1511_vm0, %v3773_v62 }
 0x114   : > { %1936 = vmatpush1.bf16.msra.mxu0 %v4373_v15  ;;  %1666 = vmatprep.mubr.bf16.mxu0 %v4369_v46 }
 0x115   : > { %1684 = vmatpush1.bf16.msra.mxu1 %v3914_v30  ;;  %1937 = vmatprep.subr.bf16.mxu0 %v3526_v54 }
 0x116   : > { %1988 = vmatprep.subr.bf16.mxu1 %v4374_v61  ;;  %v1738_v61 = vunpack.c.l.bf16 %v1730_v41 }
 0x118   : > { %2582 = vmatmul.mubr.msk.bf16.vlgmr.msra.gmra.mrb[8].mxu1 %vm1511_vm0, %v3773_v62  ;;  %1938 = vmatpush1.bf16.msra.mxu0 %v3532_v36 }
 0x119   : > { %1989 = vmatpush1.bf16.msra.mxu1 %v4375_v21  ;;  %1939 = vmatprep.subr.bf16.mxu0 %v3718_v44  ;;  %v1734_v21 = vld [vmem:[%s3976_s15 + $0x20] sm:$0xff] }
 0x11a   : > { %1990 = vmatprep.subr.bf16.mxu1 %v3530_v40  ;;  %1719 = vmatprep.mubr.bf16.mxu1 %v4369_v46 }
 0x11b   : > { %2581 = vmatmul.mubr.msk.bf16.gmra.mrb[12].mxu0 %vm1511_vm0, %v3822_v35 }
 0x11c   : > { %1940 = vmatpush1.bf16.msra.mxu0 %v3726_v18  ;;  %1967 = vmatprep.mubr.bf16.mxu0 %v4369_v46 }
 0x11d   : > { %1991 = vmatpush1.bf16.msra.mxu1 %v3534_v37  ;;  %1941 = vmatprep.subr.bf16.mxu0 %v3753_v27 }
 0x11e   : > { %1992 = vmatprep.subr.bf16.mxu1 %v3722_v1 }
 0x120   : > { %2583 = vmatmul.mubr.msk.bf16.gmra.mrb[12].mxu1 %vm1511_vm0, %v3822_v35  ;;  %1942 = vmatpush1.bf16.msra.mxu0 %v3757_v12 }
 0x121   : > { %1993 = vmatpush1.bf16.msra.mxu1 %v3730_v9  ;;  %2020 = vmatprep.mubr.bf16.mxu1 %v4369_v46 }
 0x122   : > { %1994 = vmatprep.subr.bf16.mxu1 %v3755_v31  ;;  %v3962_v31 = vpop.permute.xlu0 %1498 }
 0x123   : > { %v3960_v27 = vpop.permute.xlu1 %1493 }
 0x125   : > { %1995 = vmatpush1.bf16.msra.mxu1 %v3759_v24 }
 0x128   : > { %v3980_v15 = vpop.permute.xlu1 %1483 }
 0x1c8   : > { %v3944_v54 = vpop.f32.mrb[0].mxu0  ;;  %v3946_v40 = vpop.f32.mrb[0].mxu1 }
 0x1c9   : > { %v3948_v36 = vpop.f32.mrb[1].mxu0  ;;  %v3950_v37 = vpop.f32.mrb[1].mxu1 }
 0x1ca   : > { %v3952_v44 = vpop.f32.mrb[2].mxu0  ;;  %v3954_v1 = vpop.f32.mrb[2].mxu1 }
 0x1cb   : > { %v3956_v18 = vpop.f32.mrb[3].mxu0  ;;  %v3958_v9 = vpop.f32.mrb[3].mxu1 }
 0x1d0   : > { %v1562_v12 = vpop.f32.mrb[4].mxu0 }
 0x1d1   : > { %v1615_v24 = vpop.f32.mrb[4].mxu1  ;;  %v1563_v62 = vadd.f32 %v1562_v12, %v3960_v27  ;;  %v1564_v63 = vpop.f32.mrb[5].mxu0  ;;  %v1740_v12 = vunpack.c.l.bf16 %v1731_v52 }
 0x1d2   : > { %v1616_v35 = vadd.f32 %v1615_v24, %v3960_v27  ;;  %v1617_v17 = vpop.f32.mrb[5].mxu1  ;;  %v1565_v3 = vadd.f32 %v1564_v63, %v3960_v27  ;;  %v1566_v56 = vpop.f32.mrb[6].mxu0  ;;  %v1739_v24 = vunpack.c.h.bf16 %v1730_v41  ;;  %v1741_v63 = vunpack.c.h.bf16 %v1731_v52 }
 0x1d3   : > { %v1618_v39 = vadd.f32 %v1617_v17, %v3960_v27  ;;  %v1619_v32 = vpop.f32.mrb[6].mxu1  ;;  %v1754_v20 = vmul.f32 0.5, %v1563_v62  ;;  %v1567_v47 = vadd.f32 %v1566_v56, %v3962_v31  ;;  %v1568_v0 = vpop.f32.mrb[7].mxu0  ;;  %v1735_v62 = vld [vmem:[%s3976_s15 + $0x28] sm:$0xff] }
 0x1d4   : > { %v1756_v8 = vmul.f32 0.5, %v1616_v35  ;;  %v1620_v58 = vadd.f32 %v1619_v32, %v3962_v31  ;;  %v1621_v26 = vpop.f32.mrb[7].mxu1  ;;  %v1755_v23 = vmul.f32 0.5, %v1565_v3  ;;  %v1569_v55 = vadd.f32 %v1568_v0, %v3962_v31 }
 0x1d5   : > { %v1757_v60 = vmul.f32 0.5, %v1618_v39  ;;  %v1622_v51 = vadd.f32 %v1621_v26, %v3962_v31  ;;  %v1770_v6 = vmul.f32 1.442695, %v1754_v20  ;;  %v1762_v22 = vmul.f32 0.5, %v1567_v47 }
 0x1d6   : > { %v1774_v4 = vmul.f32 1.442695, %v1756_v8  ;;  %v1764_v14 = vmul.f32 0.5, %v1620_v58  ;;  %v1772_v38 = vmul.f32 1.442695, %v1755_v23  ;;  %v1763_v57 = vmul.f32 0.5, %v1569_v55  ;;  %v3988_v8 = vpop.permute.xlu1 %1488 }
 0x1d7   : > { %v1776_v2 = vmul.f32 1.442695, %v1757_v60  ;;  %v1765_v59 = vmul.f32 0.5, %v1622_v51  ;;  %2668 = vpow2.f32 %v1770_v6  ;;  %v1786_v16 = vmul.f32 1.442695, %v1762_v22 }
 0x1d8   : > { %2670 = vpow2.f32 %v1774_v4  ;;  %v1790_v5 = vmul.f32 1.442695, %v1764_v14  ;;  %v1788_v34 = vmul.f32 1.442695, %v1763_v57  ;;  %v1553_v3 = vadd.f32 %v3944_v54, %v3980_v15 }
 0x1d9   : > { %2672 = vpow2.f32 %v1772_v38  ;;  %v1792_v50 = vmul.f32 1.442695, %v1765_v59  ;;  %v1746_v39 = vunpack.c.l.bf16 %v1734_v21  ;;  %v1606_v20 = vadd.f32 %v3946_v40, %v3980_v15 }
 0x1da   : > { %2674 = vpow2.f32 %v1776_v2  ;;  %v1748_v47 = vunpack.c.l.bf16 %v1735_v62  ;;  %v1555_v26 = vadd.f32 %v3948_v36, %v3980_v15  ;;  %v1747_v23 = vunpack.c.h.bf16 %v1734_v21 }
 0x1db   : > { %2676 = vpow2.f32 %v1786_v16  ;;  %v1608_v54 = vadd.f32 %v3950_v37, %v3980_v15  ;;  %v1749_v4 = vunpack.c.h.bf16 %v1735_v62  ;;  %v1557_v38 = vadd.f32 %v3952_v44, %v3988_v8 }
 0x1dc   : > { %2678 = vpow2.f32 %v1790_v5  ;;  %v1610_v16 = vadd.f32 %v3954_v1, %v3988_v8  ;;  %v1559_v41 = vadd.f32 %v3956_v18, %v3988_v8  ;;  %v1612_v21 = vadd.f32 %v3958_v9, %v3988_v8 }
 0x1dd   : > { %2680 = vpow2.f32 %v1788_v34 }
 0x1de   : > { %2682 = vpow2.f32 %v1792_v50 }
 0x1e1   : > { %v2669_v35 = vpop.eup %2668 }
 0x1e2   : > { %v2671_v17 = vpop.eup %2670  ;;  %v1802_v56 = vmul.f32 %v2669_v35, %v1738_v61 }
 0x1e3   : > { %v2673_v32 = vpop.eup %2672  ;;  %v1804_v58 = vmul.f32 %v2671_v17, %v1740_v12 }
 0x1e4   : > { %v2675_v0 = vpop.eup %2674  ;;  %v1803_v60 = vmul.f32 %v2673_v32, %v1739_v24  ;;  %v1818_v55 = vadd.f32 %v1802_v56, %v1553_v3 }
 0x1e5   : > { %v2677_v51 = vpop.eup %2676  ;;  %v1805_v22 = vmul.f32 %v2675_v0, %v1741_v63  ;;  %v1820_v40 = vadd.f32 %v1804_v58, %v1606_v20  ;;  %v4022_v58 = vld [vmem:[%s4176_s3 + $0x10] sm:$0xff]  }
 0x1e6   : > { %v3994_v6 = vpop.f32.mrb[8].mxu0  ;;  %v2679_v14 = vpop.eup %2678  ;;  %v1819_v57 = vadd.f32 %v1803_v60, %v1555_v26  ;;  %v1810_v36 = vmul.f32 %v2677_v51, %v1746_v39 }
 0x1e7   : > { %v3998_v2 = vpop.f32.mrb[9].mxu0  ;;  %v2681_v59 = vpop.eup %2680  ;;  %v1821_v37 = vadd.f32 %v1805_v22, %v1608_v54  ;;  %v1812_v34 = vmul.f32 %v2679_v14, %v1748_v47 }
 0x1e8   : > { %v4002_v5 = vpop.f32.mrb[10].mxu0  ;;  %v2683_v50 = vpop.eup %2682  ;;  %v1811_v61 = vmul.f32 %v2681_v59, %v1747_v23  ;;  %v1826_v44 = vadd.f32 %v1810_v36, %v1557_v38 }
 0x1e9   : > { %v4006_v52 = vpop.f32.mrb[11].mxu0  ;;  %v1813_v12 = vmul.f32 %v2683_v50, %v1749_v4  ;;  %v1828_v24 = vadd.f32 %v1812_v34, %v1610_v16 }
 0x1ea   : > { %v1827_v1 = vadd.f32 %v1811_v61, %v1559_v41  ;;  %v1834_v35 = vpack.c.bf16 %v1826_v44, %v1818_v55 }
 0x1eb   : > { %v4010_v62 = vpop.f32.mrb[8].mxu1  ;;  %v1829_v17 = vadd.f32 %v1813_v12, %v1612_v21  ;;  %v1836_v3 = vpack.c.bf16 %v1828_v24, %v1820_v40  ;;  %v1736_v12 = vld [vmem:[%s3976_s15 + $0x30] sm:$0xff] }
 0x1ec   : > { %v4012_v63 = vpop.f32.mrb[9].mxu1  ;;  %v1835_v18 = vpack.c.bf16 %v1827_v1, %v1819_v57  ;;  %v1751_v1 = vunpack.c.h.bf16 %v1736_v12 }
 0x1ed   : > { %v4014_v39 = vpop.f32.mrb[10].mxu1  ;;  %v1837_v20 = vpack.c.bf16 %v1829_v17, %v1821_v37 }
 0x1ee   : > { %v4016_v56 = vpop.f32.mrb[11].mxu1  ;;  %v1668_v32 = vpop.f32.mrb[12].mxu0  ;;  %1943 = vmatprep.subr.bf16.mxu0 %v1835_v18 }
 0x1ef   : > { %v1669_v47 = vadd.f32 %v1668_v32, %v3960_v27  ;;  %v1670_v9 = vpop.f32.mrb[13].mxu0  ;;  %1996 = vmatprep.subr.bf16.mxu1 %v1837_v20  ;;  %1944 = vmatpush1.bf16.msra.mxu0 %v1834_v35  ;;  %v1663_v20 = vadd.f32 %v4002_v5, %v3988_v8  ;;  %v1714_v5 = vadd.f32 %v4012_v63, %v3980_v15  ;;  %v4099_v63 = vpop.permute.xlu0 %1900 }
 0x1f0   : > { %v1671_v0 = vadd.f32 %v1670_v9, %v3960_v27  ;;  %v1672_v26 = vpop.f32.mrb[14].mxu0  ;;  %1997 = vmatpush1.bf16.msra.mxu1 %v1836_v3  ;;  %2041 = vmatprep.subr.bf16.mxu0 %v4362_v10 }
 0x1f1   : > { %v1758_v23 = vmul.f32 0.5, %v1669_v47  ;;  %v1673_v60 = vadd.f32 %v1672_v26, %v3962_v31  ;;  %v1674_v55 = vpop.f32.mrb[15].mxu0  ;;  %2094 = vmatprep.subr.bf16.mxu1 %v4363_v33 }
 0x1f2   : > { %v1759_v51 = vmul.f32 0.5, %v1671_v0  ;;  %v1675_v54 = vadd.f32 %v1674_v55, %v3962_v31  ;;  %2586 = vmatmul.mubr.msk.bf16.vlgmr.msra.gmra.mrb[16].mxu0 %vm1928_vm1, %v4022_v58 }
 0x1f3   : > { %v1778_v4 = vmul.f32 1.442695, %v1758_v23  ;;  %v1721_v22 = vpop.f32.mrb[12].mxu1  ;;  %v1766_v40 = vmul.f32 0.5, %v1673_v60  ;;  %2588 = vmatmul.mubr.msk.bf16.vlgmr.msra.gmra.mrb[16].mxu1 %vm1928_vm1, %v4022_v58  ;;  %2042 = vmatpush1.bf16.msra.mxu0 %v4367_v43 }
 0x1f4   : > { %v1722_v14 = vadd.f32 %v1721_v22, %v3960_v27  ;;  %v1780_v38 = vmul.f32 1.442695, %v1759_v51  ;;  %v1723_v57 = vpop.f32.mrb[13].mxu1  ;;  %v1767_v36 = vmul.f32 0.5, %v1675_v54  ;;  %2095 = vmatpush1.bf16.msra.mxu1 %v3548_v7  ;;  %2043 = vmatprep.subr.bf16.mxu0 %v3598_v45  ;;  %v4046_v7 = vld [vmem:[%s4176_s3 + $0x18] sm:$0xff]  }
 0x1f5   : > { %2684 = vpow2.f32 %v1778_v4  ;;  %v1724_v10 = vadd.f32 %v1723_v57, %v3960_v27  ;;  %v1794_v33 = vmul.f32 1.442695, %v1766_v40  ;;  %v1725_v59 = vpop.f32.mrb[14].mxu1  ;;  %2096 = vmatprep.subr.bf16.mxu1 %v3669_v19  ;;  %1977 = vmatprep.mubr.bf16.mxu0 %v4369_v46 }
 0x1f6   : > { %v1760_v16 = vmul.f32 0.5, %v1722_v14  ;;  %2686 = vpow2.f32 %v1780_v38  ;;  %v1726_v37 = vadd.f32 %v1725_v59, %v3962_v31  ;;  %v1796_v34 = vmul.f32 1.442695, %v1767_v36  ;;  %v1727_v50 = vpop.f32.mrb[15].mxu1  ;;  %2030 = vmatprep.mubr.bf16.mxu1 %v4369_v46 }
 0x1f7   : > { %v1761_v43 = vmul.f32 0.5, %v1724_v10  ;;  %2688 = vpow2.f32 %v1794_v33  ;;  %v1728_v27 = vadd.f32 %v1727_v50, %v3962_v31  ;;  %2044 = vmatpush1.bf16.msra.mxu0 %v3686_v48  ;;  %v1732_v31 = vld [vmem:[%s3976_s15 + $0x10] sm:$0xff]  ;;  %v1718_v33 = vadd.f32 %v4016_v56, %v3988_v8  ;;  %v4101_v56 = vpop.permute.xlu1 %1905 }
 0x1f8   : > { %v1782_v45 = vmul.f32 1.442695, %v1760_v16  ;;  %v1768_v41 = vmul.f32 0.5, %v1726_v37  ;;  %2690 = vpow2.f32 %v1796_v34  ;;  %2097 = vmatpush1.bf16.msra.mxu1 %v3738_v13  ;;  %2045 = vmatprep.subr.bf16.mxu0 %v3793_v29  ;;  %v1742_v48 = vunpack.c.l.bf16 %v1732_v31 }
 0x1f9   : > { %v1784_v19 = vmul.f32 1.442695, %v1761_v43  ;;  %v1769_v61 = vmul.f32 0.5, %v1728_v27  ;;  %2098 = vmatprep.subr.bf16.mxu1 %v3830_v25  ;;  %v1743_v13 = vunpack.c.h.bf16 %v1732_v31  ;;  %v1750_v29 = vunpack.c.l.bf16 %v1736_v12  ;;  %v1733_v25 = vld [vmem:[%s3976_s15 + $0x18] sm:$0xff] }
 0x1fa   : > { %2692 = vpow2.f32 %v1782_v45  ;;  %v1798_v44 = vmul.f32 1.442695, %v1768_v41  ;;  %2587 = vmatmul.mubr.msk.bf16.gmra.mrb[20].mxu0 %vm1928_vm1, %v4046_v7  ;;  %v1744_v18 = vunpack.c.l.bf16 %v1733_v25  ;;  %v1745_v47 = vunpack.c.h.bf16 %v1733_v25 }
 0x1fb   : > { %2694 = vpow2.f32 %v1784_v19  ;;  %v1800_v21 = vmul.f32 1.442695, %v1769_v61  ;;  %2589 = vmatmul.mubr.msk.bf16.gmra.mrb[20].mxu1 %vm1928_vm1, %v4046_v7  ;;  %2046 = vmatpush1.bf16.msra.mxu0 %v3848_v49  ;;  %v1659_v49 = vadd.f32 %v3994_v6, %v3980_v15 }
 0x1fc   : > { %2696 = vpow2.f32 %v1798_v44  ;;  %2099 = vmatpush1.bf16.msra.mxu1 %v3871_v53  ;;  %2047 = vmatprep.subr.bf16.mxu0 %v3888_v28  ;;  %v1737_v53 = vld [vmem:[%s3976_s15 + $0x38] sm:$0xff] }
 0x1fd   : > { %2698 = vpow2.f32 %v1800_v21  ;;  %2100 = vmatprep.subr.bf16.mxu1 %v3903_v11  ;;  %2073 = vmatprep.mubr.bf16.mxu0 %v4369_v46  ;;  %v1661_v11 = vadd.f32 %v3998_v2, %v3980_v15  ;;  %v1752_v23 = vunpack.c.l.bf16 %v1737_v53  ;;  %v1753_v55 = vunpack.c.h.bf16 %v1737_v53  ;;  %v4111_v53 = vpop.permute.xlu1 %1910 }
 0x1fe   : > { %2126 = vmatprep.mubr.bf16.mxu1 %v4369_v46 }
 0x1ff   : > { %v2685_v24 = vpop.eup %2684  ;;  %2048 = vmatpush1.bf16.msra.mxu0 %v3909_v42  ;;  %v1665_v42 = vadd.f32 %v4006_v52, %v3988_v8  ;;  %v1716_v52 = vadd.f32 %v4014_v39, %v3988_v8  ;;  %v2180_v8 = vld [vmem:[%s4177_s4 + $0x40] sm:$0x7] }
 0x200   : > { %v2687_v35 = vpop.eup %2686  ;;  %v1806_v17 = vmul.f32 %v2685_v24, %v1742_v48  ;;  %2101 = vmatpush1.bf16.msra.mxu1 %v3914_v30  ;;  %v1712_v30 = vadd.f32 %v4010_v62, %v3980_v15  ;;  %2199 = vperm.xlu1 %2662, %v2180_v8  }
 0x201   : > { %v2689_v28 = vpop.eup %2688  ;;  %v1807_v3 = vmul.f32 %v2687_v35, %v1743_v13 }
 0x202   : > { %v2691_v32 = vpop.eup %2690  ;;  %v1814_v9 = vmul.f32 %v2689_v28, %v1750_v29  ;;  %v1822_v0 = vadd.f32 %v1806_v17, %v1659_v49 }
 0x203   : > { %v1815_v6 = vmul.f32 %v2691_v32, %v1751_v1  ;;  %v1823_v26 = vadd.f32 %v1807_v3, %v1661_v11 }
 0x204   : > { %v2693_v60 = vpop.eup %2692  ;;  %v1830_v2 = vadd.f32 %v1814_v9, %v1663_v20  ;;  %v4113_v20 = vpop.permute.xlu0 %1915 }
 0x205   : > { %v2695_v51 = vpop.eup %2694  ;;  %v1831_v54 = vadd.f32 %v1815_v6, %v1665_v42  ;;  %v1808_v4 = vmul.f32 %v2693_v60, %v1744_v18 }
 0x206   : > { %v2697_v22 = vpop.eup %2696  ;;  %v1809_v40 = vmul.f32 %v2695_v51, %v1745_v47  ;;  %v1838_v14 = vpack.c.bf16 %v1830_v2, %v1822_v0 }
 0x207   : > { %v2699_v38 = vpop.eup %2698  ;;  %v1839_v57 = vpack.c.bf16 %v1831_v54, %v1823_v26  ;;  %v1816_v36 = vmul.f32 %v2697_v22, %v1752_v23  ;;  %v1824_v10 = vadd.f32 %v1808_v4, %v1712_v30 }
 0x208   : > { %v1817_v59 = vmul.f32 %v2699_v38, %v1753_v55  ;;  %v1825_v62 = vadd.f32 %v1809_v40, %v1714_v5 }
 0x209   : > { %2049 = vmatprep.subr.bf16.mxu0 %v1839_v57  ;;  %v1832_v16 = vadd.f32 %v1816_v36, %v1716_v52 }
 0x20a   : > { %v1833_v37 = vadd.f32 %v1817_v59, %v1718_v33  ;;  %2050 = vmatpush1.bf16.msra.mxu0 %v1838_v14 }
 0x20b   : > { %v1840_v34 = vpack.c.bf16 %v1832_v16, %v1824_v10 }
 0x20c   : > { %v1841_v15 = vpack.c.bf16 %v1833_v37, %v1825_v62 }
 0x20d   : > { %2590 = vmatmul.mubr.msk.bf16.vlgmr.msra.gmra.mrb[24].mxu0 %vm1928_vm1, %v4022_v58 }
 0x20e   : > { %2102 = vmatprep.subr.bf16.mxu1 %v1841_v15  ;;  %2083 = vmatprep.mubr.bf16.mxu0 %v4369_v46 }
 0x20f   : > { %2103 = vmatpush1.bf16.msra.mxu1 %v1840_v34  ;;  %v4126_v34 = vld [vmem:[%s4176_s3 + $0x20] sm:$0x3] }
 0x212   : > { %2592 = vmatmul.mubr.msk.bf16.vlgmr.msra.gmra.mrb[24].mxu1 %vm1928_vm1, %v4022_v58 }
 0x213   : > { %2136 = vmatprep.mubr.bf16.mxu1 %v4369_v46 }
 0x215   : > { %2591 = vmatmul.mubr.msk.bf16.gmra.mrb[28].mxu0 %vm1928_vm1, %v4046_v7 }
 0x216   : > { %2238 = vmatprep.mubr.bf16.mxu0 %v4369_v46 }
 0x21a   : > { %2593 = vmatmul.mubr.msk.bf16.gmra.mrb[28].mxu1 %vm1928_vm1, %v4046_v7 }
 0x21b   : > { %2279 = vmatprep.mubr.bf16.mxu1 %v4369_v46 }
 0x2c5   : > { %v1969_v39 = vpop.f32.mrb[16].mxu0 }
 0x2c6   : > { %v2022_v58 = vpop.f32.mrb[16].mxu1  ;;  %v1971_v50 = vpop.f32.mrb[17].mxu0  ;;  %v1970_v43 = vadd.f32 %v1969_v39, %v4099_v63 }
 0x2c7   : > { %v1972_v27 = vadd.f32 %v1971_v50, %v4099_v63  ;;  %v2024_v45 = vpop.f32.mrb[17].mxu1  ;;  %v1973_v7 = vpop.f32.mrb[18].mxu0  ;;  %v2023_v41 = vadd.f32 %v2022_v58, %v4099_v63 }
 0x2c8   : > { %v2025_v19 = vadd.f32 %v2024_v45, %v4099_v63  ;;  %v1974_v61 = vadd.f32 %v1973_v7, %v4101_v56  ;;  %v2147_v31 = vmax.f32 %v1970_v43, 0.0  ;;  %v2026_v44 = vpop.f32.mrb[18].mxu1  ;;  %v1975_v21 = vpop.f32.mrb[19].mxu0 }
 0x2c9   : > { %v2027_v12 = vadd.f32 %v2026_v44, %v4101_v56  ;;  %v2149_v48 = vmax.f32 %v2023_v41, 0.0  ;;  %v1976_v13 = vadd.f32 %v1975_v21, %v4101_v56  ;;  %v2028_v29 = vpop.f32.mrb[19].mxu1  ;;  %v2148_v1 = vmax.f32 %v1972_v27, 0.0 }
 0x2ca   : > { %v2155_v25 = vmax.f32 %v1974_v61, 0.0  ;;  %v2029_v24 = vadd.f32 %v2028_v29, %v4101_v56  ;;  %v2150_v17 = vmax.f32 %v2025_v19, 0.0 }
 0x2cb   : > { %v2157_v35 = vmax.f32 %v2027_v12, 0.0  ;;  %v2156_v49 = vmax.f32 %v1976_v13, 0.0 }
 0x2cc   : > { %v2181_v28 = vpack.c.bf16 %v2155_v25, %v2147_v31  ;;  %v2158_v11 = vmax.f32 %v2029_v24, 0.0 }
 0x2cd   : > { %v2183_v3 = vpack.c.bf16 %v2157_v35, %v2149_v48  ;;  %v2182_v18 = vpack.c.bf16 %v2156_v49, %v2148_v1  ;;  %v1979_v32 = vpop.f32.mrb[20].mxu0 }
 0x2ce   : > { %v2184_v47 = vpack.c.bf16 %v2158_v11, %v2150_v17  ;;  %v2032_v9 = vpop.f32.mrb[20].mxu1  ;;  %v1981_v0 = vpop.f32.mrb[21].mxu0  ;;  %v1980_v42 = vadd.f32 %v1979_v32, %v4111_v53 }
 0x2cf   : > { %v2034_v6 = vpop.f32.mrb[21].mxu1  ;;  %v1983_v26 = vpop.f32.mrb[22].mxu0  ;;  %2206 = vmatprep.subr.bf16.mxu0 %v2182_v18  ;;  %v1982_v23 = vadd.f32 %v1981_v0, %v4111_v53  ;;  %v2033_v60 = vadd.f32 %v2032_v9, %v4111_v53 }
 0x2d0   : > { %v2036_v55 = vpop.f32.mrb[22].mxu1  ;;  %2247 = vmatprep.subr.bf16.mxu1 %v2184_v47  ;;  %v1985_v2 = vpop.f32.mrb[23].mxu0  ;;  %v2035_v51 = vadd.f32 %v2034_v6, %v4111_v53  ;;  %2207 = vmatpush1.bf16.msra.mxu0 %v2181_v28  ;;  %v1984_v30 = vadd.f32 %v1983_v26, %v4113_v20  ;;  %v2163_v54 = vmax.f32 %v1980_v42, 0.0 }
 0x2d1   : > { %v1986_v4 = vadd.f32 %v1985_v2, %v4113_v20  ;;  %v2164_v22 = vmax.f32 %v1982_v23, 0.0  ;;  %v2038_v5 = vpop.f32.mrb[23].mxu1  ;;  %2248 = vmatpush1.bf16.msra.mxu1 %v2183_v3  ;;  %v2037_v40 = vadd.f32 %v2036_v55, %v4113_v20  ;;  %v2165_v14 = vmax.f32 %v2033_v60, 0.0 }
 0x2d2   : > { %v2039_v38 = vadd.f32 %v2038_v5, %v4113_v20  ;;  %v2166_v52 = vmax.f32 %v2035_v51, 0.0  ;;  %v2171_v57 = vmax.f32 %v1984_v30, 0.0 }
 0x2d3   : > { %v2172_v36 = vmax.f32 %v1986_v4, 0.0  ;;  %v2173_v10 = vmax.f32 %v2037_v40, 0.0 }
 0x2d4   : > { %v2174_v33 = vmax.f32 %v2039_v38, 0.0  ;;  %v2189_v59 = vpack.c.bf16 %v2171_v57, %v2163_v54 }
 0x2d5   : > { %v2190_v62 = vpack.c.bf16 %v2172_v36, %v2164_v22  ;;  %v2191_v16 = vpack.c.bf16 %v2173_v10, %v2165_v14 }
 0x2d6   : > { %v2192_v37 = vpack.c.bf16 %v2174_v33, %v2166_v52 }
 0x2d7   : > { %2208 = vmatprep.subr.bf16.mxu0 %v2190_v62 }
 0x2d8   : > { %2249 = vmatprep.subr.bf16.mxu1 %v2192_v37  ;;  %2209 = vmatpush1.bf16.msra.mxu0 %v2189_v59 }
 0x2d9   : > { %2250 = vmatpush1.bf16.msra.mxu1 %v2191_v16 }
 0x2db   : > { %2594 = vmatmul.mubr.msk.bf16.vlgmr.msra.gmra.mrb[32].mxu0 %vm2202_vm2, %v4126_v34 }
 0x2dc   : > { %2595 = vmatmul.mubr.msk.bf16.vlgmr.msra.gmra.mrb[32].mxu1 %vm2202_vm2, %v4126_v34  ;;  %2320 = vmatprep.mubr.bf16.mxu0 %v4369_v46 }
 0x2dd   : > { %2361 = vmatprep.mubr.bf16.mxu1 %v4369_v46 }
 0x2e0   : > { %v2075_v15 = vpop.f32.mrb[24].mxu0 }
 0x2e1   : > { %v2076_v8 = vadd.f32 %v2075_v15, %v4099_v63  ;;  %v2077_v39 = vpop.f32.mrb[25].mxu0 }
 0x2e2   : > { %v2078_v58 = vadd.f32 %v2077_v39, %v4099_v63  ;;  %v2079_v50 = vpop.f32.mrb[26].mxu0 }
 0x2e3   : > { %v2080_v43 = vadd.f32 %v2079_v50, %v4101_v56  ;;  %v2081_v27 = vpop.f32.mrb[27].mxu0  ;;  %v2151_v7 = vmax.f32 %v2076_v8, 0.0 }
 0x2e4   : > { %v2082_v45 = vadd.f32 %v2081_v27, %v4101_v56  ;;  %v2152_v31 = vmax.f32 %v2078_v58, 0.0 }
 0x2e5   : > { %v2128_v41 = vpop.f32.mrb[24].mxu1  ;;  %v2159_v19 = vmax.f32 %v2080_v43, 0.0 }
 0x2e6   : > { %v2129_v61 = vadd.f32 %v2128_v41, %v4099_v63  ;;  %v2130_v44 = vpop.f32.mrb[25].mxu1  ;;  %v2160_v46 = vmax.f32 %v2082_v45, 0.0 }
 0x2e7   : > { %v2131_v21 = vadd.f32 %v2130_v44, %v4099_v63  ;;  %v2185_v12 = vpack.c.bf16 %v2159_v19, %v2151_v7  ;;  %v2132_v48 = vpop.f32.mrb[26].mxu1 }
 0x2e8   : > { %v2133_v13 = vadd.f32 %v2132_v48, %v4101_v56  ;;  %v2186_v29 = vpack.c.bf16 %v2160_v46, %v2152_v31  ;;  %v2134_v25 = vpop.f32.mrb[27].mxu1  ;;  %v2085_v24 = vpop.f32.mrb[28].mxu0  ;;  %v2153_v17 = vmax.f32 %v2129_v61, 0.0 }
 0x2e9   : > { %v2135_v1 = vadd.f32 %v2134_v25, %v4101_v56  ;;  %v2086_v35 = vadd.f32 %v2085_v24, %v4111_v53  ;;  %v2087_v49 = vpop.f32.mrb[29].mxu0  ;;  %v2154_v18 = vmax.f32 %v2131_v21, 0.0 }
 0x2ea   : > { %v2161_v28 = vmax.f32 %v2133_v13, 0.0  ;;  %v2088_v11 = vadd.f32 %v2087_v49, %v4111_v53  ;;  %v2089_v3 = vpop.f32.mrb[30].mxu0  ;;  %2288 = vmatprep.subr.bf16.mxu0 %v2186_v29 }
 0x2eb   : > { %v2162_v63 = vmax.f32 %v2135_v1, 0.0  ;;  %v2090_v32 = vadd.f32 %v2089_v3, %v4113_v20  ;;  %v2091_v47 = vpop.f32.mrb[31].mxu0  ;;  %2289 = vmatpush1.bf16.msra.mxu0 %v2185_v12  ;;  %v2167_v56 = vmax.f32 %v2086_v35, 0.0 }
 0x2ec   : > { %v2187_v9 = vpack.c.bf16 %v2161_v28, %v2153_v17  ;;  %v2092_v0 = vadd.f32 %v2091_v47, %v4113_v20  ;;  %v2168_v60 = vmax.f32 %v2088_v11, 0.0 }
 0x2ed   : > { %v2188_v42 = vpack.c.bf16 %v2162_v63, %v2154_v18  ;;  %v2138_v6 = vpop.f32.mrb[28].mxu1  ;;  %v2175_v26 = vmax.f32 %v2090_v32, 0.0 }
 0x2ee   : > { %v2139_v23 = vadd.f32 %v2138_v6, %v4111_v53  ;;  %v2140_v55 = vpop.f32.mrb[29].mxu1  ;;  %v2176_v2 = vmax.f32 %v2092_v0, 0.0 }
 0x2ef   : > { %v2141_v51 = vadd.f32 %v2140_v55, %v4111_v53  ;;  %v2193_v30 = vpack.c.bf16 %v2175_v26, %v2167_v56  ;;  %v2142_v54 = vpop.f32.mrb[30].mxu1  ;;  %2329 = vmatprep.subr.bf16.mxu1 %v2188_v42  ;;  %v2200_v53 = vpop.permute.xlu1 %2199 }
 0x2f0   : > { %v2143_v4 = vadd.f32 %v2142_v54, %v4113_v20  ;;  %v2194_v22 = vpack.c.bf16 %v2176_v2, %v2168_v60  ;;  %v2144_v5 = vpop.f32.mrb[31].mxu1  ;;  %2330 = vmatpush1.bf16.msra.mxu1 %v2187_v9  ;;  %v2169_v14 = vmax.f32 %v2139_v23, 0.0 }
 0x2f1   : > { %v2145_v40 = vadd.f32 %v2144_v5, %v4113_v20  ;;  %v2170_v52 = vmax.f32 %v2141_v51, 0.0 }
 0x2f2   : > { %v2177_v38 = vmax.f32 %v2143_v4, 0.0  ;;  %2290 = vmatprep.subr.bf16.mxu0 %v2194_v22 }
 0x2f3   : > { %v2178_v57 = vmax.f32 %v2145_v40, 0.0  ;;  %2291 = vmatpush1.bf16.msra.mxu0 %v2193_v30 }
 0x2f4   : > { %v2195_v36 = vpack.c.bf16 %v2177_v38, %v2169_v14 }
 0x2f5   : > { %v2196_v10 = vpack.c.bf16 %v2178_v57, %v2170_v52 }
 0x2f6   : > { %2596 = vmatmul.mubr.msk.bf16.vlgmr.msra.gmra.mrb[36].mxu0 %vm2202_vm2, %v4126_v34 }
 0x2f7   : > { %2331 = vmatprep.subr.bf16.mxu1 %v2196_v10 }
 0x2f8   : > { %2332 = vmatpush1.bf16.msra.mxu1 %v2195_v36 }
 0x2fb   : > { %2597 = vmatmul.mubr.msk.bf16.vlgmr.msra.gmra.mrb[36].mxu1 %vm2202_vm2, %v4126_v34 }
 0x3ae   : > { %v2240_v33 = vpop.f32.mrb[32].mxu0 }
 0x3af   : > { %v2281_v59 = vpop.f32.mrb[32].mxu1  ;;  %v2242_v20 = vpop.f32.mrb[33].mxu0  ;;  %v2241_v62 = vadd.f32 %v2240_v33, %v2200_v53 }
 0x3b0   : > { %v2283_v16 = vpop.f32.mrb[33].mxu1  ;;  %v2244_v37 = vpop.f32.mrb[34].mxu0  ;;  %v2243_v15 = vadd.f32 %v2242_v20, %v2200_v53  ;;  %v2282_v8 = vadd.f32 %v2281_v59, %v2200_v53 }
 0x3b1   : > { %v2285_v39 = vpop.f32.mrb[34].mxu1  ;;  %v2284_v58 = vadd.f32 %v2283_v16, %v2200_v53  ;;  %v2598_v50 = vmul.f32 -1.442695, %v2241_v62  ;;  %v2245_v43 = vpop.f32.mrb[35].mxu0 }
 0x3b2   : > { %v2599_v27 = vmul.f32 -1.442695, %v2243_v15  ;;  %v2600_v45 = vmul.f32 -1.442695, %v2282_v8  ;;  %v2286_v7 = vpop.f32.mrb[35].mxu1 }
 0x3b3   : > { %2700 = vpow2.f32 %v2598_v50  ;;  %v2601_v41 = vmul.f32 -1.442695, %v2284_v58 }
 0x3b4   : > { %2702 = vpow2.f32 %v2599_v27 }
 0x3b5   : > { %2704 = vpow2.f32 %v2600_v45 }
 0x3b6   : > { %2706 = vpow2.f32 %v2601_v41 }
 0x3bd   : > { %v2701_v34 = vpop.eup %2700 }
 0x3be   : > { %v2703_v19 = vpop.eup %2702  ;;  %v2394_v61 = vadd.f32 1.0, %v2701_v34 }
 0x3bf   : > { %v2705_v31 = vpop.eup %2704  ;;  %v2395_v44 = vadd.f32 1.0, %v2703_v19 }
 0x3c0   : > { %v2707_v46 = vpop.eup %2706  ;;  %v2396_v21 = vadd.f32 1.0, %v2705_v31  ;;  %2708 = vrcp.f32 %v2394_v61 }
 0x3c1   : > { %v2397_v12 = vadd.f32 1.0, %v2707_v46  ;;  %2710 = vrcp.f32 %v2395_v44 }
 0x3c2   : > { %2712 = vrcp.f32 %v2396_v21 }
 0x3c3   : > { %2714 = vrcp.f32 %v2397_v12 }
 0x3c9   : > { %v2322_v48 = vpop.f32.mrb[36].mxu0 }
 0x3ca   : > { %v2323_v13 = vadd.f32 %v2322_v48, %v2200_v53  ;;  %v2324_v29 = vpop.f32.mrb[37].mxu0  ;;  %v2709_v25 = vpop.eup %2708 }
 0x3cb   : > { %v2325_v24 = vadd.f32 %v2324_v29, %v2200_v53  ;;  %v2326_v1 = vpop.f32.mrb[38].mxu0  ;;  %v2711_v35 = vpop.eup %2710 }
 0x3cc   : > { %v2602_v49 = vmul.f32 -1.442695, %v2323_v13  ;;  %v2327_v17 = vpop.f32.mrb[39].mxu0  ;;  %v2713_v28 = vpop.eup %2712  ;;  %v2426_v3 = vcombine.low %v2709_v25, %v2711_v35 }
 0x3cd   : > { %v2603_v11 = vmul.f32 -1.442695, %v2325_v24  ;;  %v2715_v18 = vpop.eup %2714 }
 0x3ce   : > { %2716 = vpow2.f32 %v2602_v49  ;;  %v2363_v63 = vpop.f32.mrb[36].mxu1  ;;  %v2427_v47 = vcombine.low %v2713_v28, %v2715_v18  ;;  %2434 = vst [vmem:[%s4158_s29] sm:$0x77] %v2426_v3 }
 0x3cf   : > { %v2364_v32 = vadd.f32 %v2363_v63, %v2200_v53  ;;  %2718 = vpow2.f32 %v2603_v11  ;;  %v2365_v9 = vpop.f32.mrb[37].mxu1 }
 0x3d0   : > { %v2366_v0 = vadd.f32 %v2365_v9, %v2200_v53  ;;  %v2367_v42 = vpop.f32.mrb[38].mxu1  ;;  %2435 = vst [vmem:[%s4158_s29 + $0x8] sm:$0x77] %v2427_v47 }
 0x3d1   : > { %v2604_v56 = vmul.f32 -1.442695, %v2364_v32  ;;  %v2368_v6 = vpop.f32.mrb[39].mxu1 }
 0x3d2   : > { %v2605_v26 = vmul.f32 -1.442695, %v2366_v0 }
 0x3d3   : > { %2720 = vpow2.f32 %v2604_v56 }
 0x3d4   : > { %2722 = vpow2.f32 %v2605_v26 }
 0x3d8   : > { %v2717_v23 = vpop.eup %2716 }
 0x3d9   : > { %v2719_v60 = vpop.eup %2718  ;;  %v2398_v55 = vadd.f32 1.0, %v2717_v23 }
 0x3da   : > { %v2399_v2 = vadd.f32 1.0, %v2719_v60 }
 0x3db   : > { %2724 = vrcp.f32 %v2398_v55 }
 0x3dc   : > { %2726 = vrcp.f32 %v2399_v2 }
 0x3dd   : > { %v2721_v51 = vpop.eup %2720 }
 0x3de   : > { %v2723_v30 = vpop.eup %2722  ;;  %v2400_v54 = vadd.f32 1.0, %v2721_v51 }
 0x3df   : > { %v2401_v4 = vadd.f32 1.0, %v2723_v30 }
 0x3e0   : > { %2728 = vrcp.f32 %v2400_v54 }
 0x3e1   : > { %2730 = vrcp.f32 %v2401_v4 }
 0x3e5   : > { %v2725_v22 = vpop.eup %2724 }
 0x3e6   : > { %v2727_v5 = vpop.eup %2726 }
 0x3e7   : > { %v2428_v40 = vcombine.low %v2725_v22, %v2727_v5 }
 0x3e9   : > { %2436 = vst [vmem:[%s4158_s29 + $0x10] sm:$0x77] %v2428_v40 }
 0x3ea   : > { %v2729_v14 = vpop.eup %2728 }
 0x3eb   : > { %v2731_v38 = vpop.eup %2730 }
 0x3ec   : > { %v2429_v52 = vcombine.low %v2729_v14, %v2731_v38 }
 0x3ee   : > { %2437 = vst [vmem:[%s4158_s29 + $0x18] sm:$0x77] %v2429_v52 }
 0x3ef PF: > { %s15_s20 = sadd.s32 1, %s2754_s20   ;;  %s4376_s18 = smov %s2750_s19 }
 0x3f0   : > { %p12_p5 = scmp.ge.s32.totalorder %s15_s20, 4   ;;  %s4377_s19 = smov %s4379_s21 }
 0x3f2   :  { %14 = sbr.rel (!%p12_p5) target bundleno = 2 (0x2), region = 76 }

</bundles_post_ra>
